<compile_context>
chip_gen: v6e
topology: v6e:2x2x1
jax: 0.10.0
libtpu: 0.0.40
codegen_flags: <defaults>
</compile_context>

<pallas_src>
import functools
import math

import jax
import jax.numpy as jnp
from jax.experimental import pallas as pl
from jax.experimental.pallas import tpu as pltpu


# ----------------------------------------------------------------------------
# Kernel 1: one fused GCT layer, one sequence (batch element) per grid step.
# ----------------------------------------------------------------------------
def _gct_layer_kernel(x_ref, pad_row_ref, pad_col_ref, causal_ref, *refs,
                      use_prior, eps, inv_scale):
    idx = 0
    if use_prior:
        prior_ref = refs[idx]
        idx += 1
    (wq_ref, bq_ref, wk_ref, bk_ref, wv_ref, bv_ref,
     g1_ref, b1_ref, g2_ref, b2_ref,
     wff_ref, bff_ref,
     out_ref, attn_ref) = refs[idx:]

    x = x_ref[...].astype(jnp.float32)                 # (S, D)
    pad_row = pad_row_ref[...].astype(jnp.float32)     # (S, 1)  query padding
    pad_col = pad_col_ref[...].astype(jnp.float32)     # (1, S)  key padding
    causal = causal_ref[...].astype(jnp.float32)       # (S, S)

    def layer_norm(v, g, b):
        # single-pass statistics: var = E[v^2] - mean^2
        mean = jnp.mean(v, axis=-1, keepdims=True)
        var = jnp.mean(v * v, axis=-1, keepdims=True) - mean * mean
        return (v - mean) * jax.lax.rsqrt(var + eps) * g + b

    # --- sublayer 0: self-attention on the pre-normed input -----------------
    xn = layer_norm(x, g1_ref[...], b1_ref[...])

    q = jnp.dot(xn, wq_ref[...], preferred_element_type=jnp.float32) + bq_ref[...]
    k = jnp.dot(xn, wk_ref[...], preferred_element_type=jnp.float32) + bk_ref[...]
    v = jnp.dot(xn, wv_ref[...], preferred_element_type=jnp.float32) + bv_ref[...]

    # scores = Q @ K^T / sqrt(d_model)   (contract over D, no explicit transpose)
    scores = jax.lax.dot_general(
        q, k, (((1,), (1,)), ((), ())),
        preferred_element_type=jnp.float32) * inv_scale          # (S, S)

    combined = pad_col * causal                      # key-padding & causal mask
    valid = combined > 0.0
    row_any = jnp.sum(combined, axis=-1, keepdims=True) > 0.0    # (S, 1)

    scores = jnp.where(valid, scores, -1e30)
    scores = jnp.where(row_any, scores, 0.0)

    m = jnp.max(scores, axis=-1, keepdims=True)
    e = jnp.exp(scores - m)
    attn = e / jnp.sum(e, axis=-1, keepdims=True)
    attn = jnp.where(row_any, attn, 0.0)
    attn = attn * pad_row                             # zero padded query rows

    if use_prior:
        ctx = jnp.dot(prior_ref[...].astype(jnp.float32), v,
                      preferred_element_type=jnp.float32)
    else:
        ctx = jnp.dot(attn, v, preferred_element_type=jnp.float32)

    # TODO(synk): dropout omitted (inference / eval mode semantics).
    res1 = x + ctx

    # --- sublayer 1: feed-forward on the pre-normed residual ----------------
    xn2 = layer_norm(res1, g2_ref[...], b2_ref[...])
    ff = jnp.dot(xn2, wff_ref[...], preferred_element_type=jnp.float32) + bff_ref[...]
    out = res1 + ff

    out_ref[...] = out.astype(out_ref.dtype)
    attn_ref[...] = attn.astype(attn_ref.dtype)


def gct_layer(x, pad_row, pad_col, causal, prior, params, *, use_prior):
    B, S, D = x.shape
    kernel = functools.partial(_gct_layer_kernel, use_prior=use_prior,
                               eps=1e-6, inv_scale=1.0 / math.sqrt(D))

    spec_bsd = pl.BlockSpec((None, S, D), lambda b: (b, 0, 0))
    spec_bss = pl.BlockSpec((None, S, S), lambda b: (b, 0, 0))
    spec_dd = pl.BlockSpec((D, D), lambda b: (0, 0))     # resident across grid
    spec_1d = pl.BlockSpec((1, D), lambda b: (0, 0))     # resident across grid

    in_specs = [
        spec_bsd,                                        # x
        pl.BlockSpec((None, S, 1), lambda b: (b, 0, 0)), # pad mask (query rows)
        pl.BlockSpec((None, 1, S), lambda b: (b, 0, 0)), # pad mask (key cols)
        spec_bss,                                        # causal mask
    ]
    inputs = [x, pad_row, pad_col, causal]
    if use_prior:
        in_specs.append(spec_bss)
        inputs.append(prior)
    in_specs += [spec_dd, spec_1d, spec_dd, spec_1d, spec_dd, spec_1d,  # Q,K,V
                 spec_1d, spec_1d, spec_1d, spec_1d,                    # LN1, LN2
                 spec_dd, spec_1d]                                      # FF
    inputs += [params["wq"], params["bq"], params["wk"], params["bk"],
               params["wv"], params["bv"],
               params["ln1_g"], params["ln1_b"],
               params["ln2_g"], params["ln2_b"],
               params["wff"], params["bff"]]

    flops = B * (8 * S * D * D + 4 * S * S * D)
    bytes_acc = 4 * (x.size + pad_row.size + pad_col.size + causal.size
                     + (prior.size if use_prior else 0)
                     + 4 * D * D + 8 * D
                     + B * S * D + B * S * S)

    out, attn = pl.pallas_call(
        kernel,
        out_shape=(jax.ShapeDtypeStruct((B, S, D), x.dtype),
                   jax.ShapeDtypeStruct((B, S, S), jnp.float32)),
        grid=(B,),
        in_specs=in_specs,
        out_specs=(spec_bsd, spec_bss),
        compiler_params=pltpu.CompilerParams(
            dimension_semantics=("parallel",)),
        cost_estimate=pl.CostEstimate(
            flops=flops,
            transcendentals=B * (S * S + 2 * S),
            bytes_accessed=bytes_acc),
    )(*inputs)
    return out, attn


# ----------------------------------------------------------------------------
# Kernel 2: KLD regularizer between consecutive attention matrices.
# Input is the stacked attention tensor reshaped to (L+1, B*S, S) so every
# reduction is a plain 2-D lane/sublane reduce.
# ----------------------------------------------------------------------------
def _kld_kernel(attn_ref, out_ref, *, num_mats, scale):
    acc = None
    for i in range(1, num_mats):
        p = attn_ref[i - 1].astype(jnp.float32)          # (B*S, S)
        q = attn_ref[i].astype(jnp.float32)
        log_p = jnp.log(jnp.maximum(p, 1e-12))
        log_q = jnp.log(jnp.maximum(q, 1e-12))
        term = p * (log_p - log_q)
        acc = term if acc is None else acc + term
    row = jnp.sum(acc, axis=-1, keepdims=True)           # (B*S, 1)
    total = jnp.sum(row, axis=0, keepdims=True)          # (1, 1)
    out_ref[...] = total * scale


def kld_loss(stacked_attn):
    # stacked_attn: (L+1, B, S, S)
    L1, B, S, _ = stacked_attn.shape
    flat = stacked_attn.reshape(L1, B * S, S).astype(jnp.float32)
    scale = 1.0 / ((L1 - 1) * B * S)                     # mean over pairs & (B,S)
    kernel = functools.partial(_kld_kernel, num_mats=L1, scale=scale)
    out = pl.pallas_call(
        kernel,
        out_shape=jax.ShapeDtypeStruct((1, 1), jnp.float32),
        grid=(1,),
        in_specs=[pl.BlockSpec((L1, B * S, S), lambda i: (0, 0, 0))],
        out_specs=pl.BlockSpec((1, 1), lambda i: (0, 0)),
        cost_estimate=pl.CostEstimate(
            flops=5 * (L1 - 1) * B * S * S,
            transcendentals=2 * (L1 - 1) * B * S * S,
            bytes_accessed=flat.size * 4 + 4),
    )(flat)
    return out[0, 0]


# ----------------------------------------------------------------------------
# GraphConvTransformer forward wrapper.
# ----------------------------------------------------------------------------
def graph_conv_transformer_forward(layers_params, seq_emds, pad_masks,
                                   causal_masks, priors):
    B, S, D = seq_emds.shape
    pad_f = pad_masks.astype(seq_emds.dtype)
    pad_row = pad_f.reshape(B, S, 1)
    pad_col = pad_f.reshape(B, 1, S)
    causal_f = causal_masks.astype(seq_emds.dtype)
    priors_f = priors.astype(jnp.float32)

    attn_mats = [priors_f]
    x = seq_emds
    for i, p in enumerate(layers_params):
        x, attn = gct_layer(x, pad_row, pad_col, causal_f,
                            priors_f if i == 0 else None, p,
                            use_prior=(i == 0))
        attn_mats.append(attn)

    stacked = jnp.stack(attn_mats, axis=0)               # (L+1, B, S, S)
    kld = kld_loss(stacked)
    return x, attn_mats[-1], kld


def init_params(key, d_model, num_layers):
    layers = []
    scale = 1.0 / math.sqrt(d_model)

    def u(k, shape):
        return jax.random.uniform(k, shape, jnp.float32, -scale, scale)

    for _ in range(num_layers):
        key, *ks = jax.random.split(key, 9)
        layers.append({
            # linear weights stored pre-transposed as (D_in, D_out)
            "wq": u(ks[0], (d_model, d_model)), "bq": u(ks[1], (1, d_model)),
            "wk": u(ks[2], (d_model, d_model)), "bk": u(ks[3], (1, d_model)),
            "wv": u(ks[4], (d_model, d_model)), "bv": u(ks[5], (1, d_model)),
            "wff": u(ks[6], (d_model, d_model)), "bff": u(ks[7], (1, d_model)),
            # LayerNorm default init
            "ln1_g": jnp.ones((1, d_model), jnp.float32),
            "ln1_b": jnp.zeros((1, d_model), jnp.float32),
            "ln2_g": jnp.ones((1, d_model), jnp.float32),
            "ln2_b": jnp.zeros((1, d_model), jnp.float32),
        })
    return layers


if __name__ == "__main__":
    B, S, D, L = 2, 16, 128, 2   # d_model lane-dense (128), small seq/batch

    key = jax.random.PRNGKey(0)
    k_x, k_prior, k_p = jax.random.split(key, 3)

    seq_emds = jax.random.normal(k_x, (B, S, D), jnp.float32)

    # pad masks: first 12 tokens valid in seq 0, first 10 in seq 1
    lengths = jnp.array([12, 10])
    pad_masks = (jnp.arange(S)[None, :] < lengths[:, None]).astype(jnp.float32)

    # causal masks: lower triangular, shared across batch
    causal_masks = jnp.tile(jnp.tril(jnp.ones((S, S), jnp.float32))[None],
                            (B, 1, 1))

    # priors: row-stochastic attention prior
    priors = jax.nn.softmax(
        jax.random.normal(k_prior, (B, S, S), jnp.float32), axis=-1)

    params = init_params(k_p, D, L)

    out, attn_last, kld = graph_conv_transformer_forward(
        params, seq_emds, pad_masks, causal_masks, priors)
    jax.block_until_ready((out, attn_last, kld))

    assert out.shape == (B, S, D)
    assert attn_last.shape == (B, S, S)
    assert kld.shape == ()
    print("KERNEL_OK")
</pallas_src>

<mosaic_0001>
module attributes {stable_mosaic.version = 11 : i64} {
  func.func @_gct_layer_kernel(%arg0: i32, %arg1: memref<1x16x128xf32, #tpu.memory_space<vmem>>, %arg2: memref<1x16x1xf32, #tpu.memory_space<vmem>>, %arg3: memref<1x1x16xf32, #tpu.memory_space<vmem>>, %arg4: memref<1x16x16xf32, #tpu.memory_space<vmem>>, %arg5: memref<1x16x16xf32, #tpu.memory_space<vmem>>, %arg6: memref<128x128xf32, #tpu.memory_space<vmem>>, %arg7: memref<1x128xf32, #tpu.memory_space<vmem>>, %arg8: memref<128x128xf32, #tpu.memory_space<vmem>>, %arg9: memref<1x128xf32, #tpu.memory_space<vmem>>, %arg10: memref<128x128xf32, #tpu.memory_space<vmem>>, %arg11: memref<1x128xf32, #tpu.memory_space<vmem>>, %arg12: memref<1x128xf32, #tpu.memory_space<vmem>>, %arg13: memref<1x128xf32, #tpu.memory_space<vmem>>, %arg14: memref<1x128xf32, #tpu.memory_space<vmem>>, %arg15: memref<1x128xf32, #tpu.memory_space<vmem>>, %arg16: memref<128x128xf32, #tpu.memory_space<vmem>>, %arg17: memref<1x128xf32, #tpu.memory_space<vmem>>, %arg18: memref<1x16x128xf32, #tpu.memory_space<vmem>>, %arg19: memref<1x16x16xf32, #tpu.memory_space<vmem>>) attributes {dimension_semantics = [#tpu.dimension_semantics<parallel>], iteration_bounds = array<i64: 2>, scalar_prefetch = 0 : i64, scratch_operands = 0 : i64, tpu.core_type = #tpu.core_type<tc>, window_params = [{transform_indices = @transform_0, window_bounds = array<i64: 1, 16, 128>}, {transform_indices = @transform_1, window_bounds = array<i64: 1, 16, 1>}, {transform_indices = @transform_2, window_bounds = array<i64: 1, 1, 16>}, {transform_indices = @transform_3, window_bounds = array<i64: 1, 16, 16>}, {transform_indices = @transform_4, window_bounds = array<i64: 1, 16, 16>}, {pipeline_mode = #tpu.pipeline_mode<synchronous>, transform_indices = @transform_5, window_bounds = array<i64: 128, 128>}, {pipeline_mode = #tpu.pipeline_mode<synchronous>, transform_indices = @transform_6, window_bounds = array<i64: 1, 128>}, {pipeline_mode = #tpu.pipeline_mode<synchronous>, transform_indices = @transform_7, window_bounds = array<i64: 128, 128>}, {pipeline_mode = #tpu.pipeline_mode<synchronous>, transform_indices = @transform_8, window_bounds = array<i64: 1, 128>}, {pipeline_mode = #tpu.pipeline_mode<synchronous>, transform_indices = @transform_9, window_bounds = array<i64: 128, 128>}, {pipeline_mode = #tpu.pipeline_mode<synchronous>, transform_indices = @transform_10, window_bounds = array<i64: 1, 128>}, {pipeline_mode = #tpu.pipeline_mode<synchronous>, transform_indices = @transform_11, window_bounds = array<i64: 1, 128>}, {pipeline_mode = #tpu.pipeline_mode<synchronous>, transform_indices = @transform_12, window_bounds = array<i64: 1, 128>}, {pipeline_mode = #tpu.pipeline_mode<synchronous>, transform_indices = @transform_13, window_bounds = array<i64: 1, 128>}, {pipeline_mode = #tpu.pipeline_mode<synchronous>, transform_indices = @transform_14, window_bounds = array<i64: 1, 128>}, {pipeline_mode = #tpu.pipeline_mode<synchronous>, transform_indices = @transform_15, window_bounds = array<i64: 128, 128>}, {pipeline_mode = #tpu.pipeline_mode<synchronous>, transform_indices = @transform_16, window_bounds = array<i64: 1, 128>}, {transform_indices = @transform_17, window_bounds = array<i64: 1, 16, 128>}, {transform_indices = @transform_18, window_bounds = array<i64: 1, 16, 16>}]} {
    %c0 = arith.constant 0 : index
    %c0_0 = arith.constant 0 : index
    %c0_1 = arith.constant 0 : index
    %0 = vector.load %arg1[%c0, %c0_0, %c0_1] : memref<1x16x128xf32, #tpu.memory_space<vmem>>, vector<1x16x128xf32>
    %1 = vector.shape_cast %0 : vector<1x16x128xf32> to vector<16x128xf32>
    %c0_2 = arith.constant 0 : index
    %c0_3 = arith.constant 0 : index
    %c0_4 = arith.constant 0 : index
    %2 = vector.load %arg2[%c0_2, %c0_3, %c0_4] : memref<1x16x1xf32, #tpu.memory_space<vmem>>, vector<1x16x1xf32>
    %3 = vector.shape_cast %2 : vector<1x16x1xf32> to vector<16x1xf32>
    %c0_5 = arith.constant 0 : index
    %c0_6 = arith.constant 0 : index
    %c0_7 = arith.constant 0 : index
    %4 = vector.load %arg3[%c0_5, %c0_6, %c0_7] : memref<1x1x16xf32, #tpu.memory_space<vmem>>, vector<1x1x16xf32>
    %5 = vector.shape_cast %4 : vector<1x1x16xf32> to vector<1x16xf32>
    %c0_8 = arith.constant 0 : index
    %c0_9 = arith.constant 0 : index
    %c0_10 = arith.constant 0 : index
    %6 = vector.load %arg4[%c0_8, %c0_9, %c0_10] : memref<1x16x16xf32, #tpu.memory_space<vmem>>, vector<1x16x16xf32>
    %7 = vector.shape_cast %6 : vector<1x16x16xf32> to vector<16x16xf32>
    %c0_11 = arith.constant 0 : index
    %c0_12 = arith.constant 0 : index
    %8 = vector.load %arg12[%c0_11, %c0_12] : memref<1x128xf32, #tpu.memory_space<vmem>>, vector<1x128xf32>
    %c0_13 = arith.constant 0 : index
    %c0_14 = arith.constant 0 : index
    %9 = vector.load %arg13[%c0_13, %c0_14] : memref<1x128xf32, #tpu.memory_space<vmem>>, vector<1x128xf32>
    %cst = arith.constant dense<0.000000e+00> : vector<16xf32>
    %10 = vector.multi_reduction <add>, %1, %cst [1] : vector<16x128xf32> to vector<16xf32>
    %11 = vector.shape_cast %10 : vector<16xf32> to vector<16x1xf32>
    %cst_15 = arith.constant 1.280000e+02 : f32
    %12 = vector.broadcast %cst_15 : f32 to vector<16x1xf32>
    %13 = arith.divf %11, %12 : vector<16x1xf32>
    %14 = arith.mulf %1, %1 : vector<16x128xf32>
    %cst_16 = arith.constant dense<0.000000e+00> : vector<16xf32>
    %15 = vector.multi_reduction <add>, %14, %cst_16 [1] : vector<16x128xf32> to vector<16xf32>
    %16 = vector.shape_cast %15 : vector<16xf32> to vector<16x1xf32>
    %cst_17 = arith.constant 1.280000e+02 : f32
    %17 = vector.broadcast %cst_17 : f32 to vector<16x1xf32>
    %18 = arith.divf %16, %17 : vector<16x1xf32>
    %19 = arith.mulf %13, %13 : vector<16x1xf32>
    %20 = arith.subf %18, %19 : vector<16x1xf32>
    %21 = vector.broadcast %13 : vector<16x1xf32> to vector<16x128xf32>
    %22 = arith.subf %1, %21 : vector<16x128xf32>
    %cst_18 = arith.constant 9.99999997E-7 : f32
    %23 = vector.broadcast %cst_18 : f32 to vector<16x1xf32>
    %24 = arith.addf %20, %23 : vector<16x1xf32>
    %25 = math.rsqrt %24 : vector<16x1xf32>
    %26 = vector.broadcast %25 : vector<16x1xf32> to vector<16x128xf32>
    %27 = arith.mulf %22, %26 : vector<16x128xf32>
    %28 = vector.broadcast %8 : vector<1x128xf32> to vector<16x128xf32>
    %29 = arith.mulf %27, %28 : vector<16x128xf32>
    %30 = vector.broadcast %9 : vector<1x128xf32> to vector<16x128xf32>
    %31 = arith.addf %29, %30 : vector<16x128xf32>
    %c0_19 = arith.constant 0 : index
    %c0_20 = arith.constant 0 : index
    %32 = vector.load %arg6[%c0_19, %c0_20] : memref<128x128xf32, #tpu.memory_space<vmem>>, vector<128x128xf32>
    %cst_21 = arith.constant dense<0.000000e+00> : vector<16x128xf32>
    %33 = tpu.matmul %31, %32, %cst_21 {dimension_numbers = #tpu.dot_dimension_numbers<[1], [0], [0], [1], [0, 0, 1, 1], [], []>} : vector<16x128xf32>, vector<128x128xf32>, vector<16x128xf32> -> vector<16x128xf32>
    %c0_22 = arith.constant 0 : index
    %c0_23 = arith.constant 0 : index
    %34 = vector.load %arg7[%c0_22, %c0_23] : memref<1x128xf32, #tpu.memory_space<vmem>>, vector<1x128xf32>
    %35 = vector.broadcast %34 : vector<1x128xf32> to vector<16x128xf32>
    %36 = arith.addf %33, %35 : vector<16x128xf32>
    %c0_24 = arith.constant 0 : index
    %c0_25 = arith.constant 0 : index
    %37 = vector.load %arg8[%c0_24, %c0_25] : memref<128x128xf32, #tpu.memory_space<vmem>>, vector<128x128xf32>
    %cst_26 = arith.constant dense<0.000000e+00> : vector<16x128xf32>
    %38 = tpu.matmul %31, %37, %cst_26 {dimension_numbers = #tpu.dot_dimension_numbers<[1], [0], [0], [1], [0, 0, 1, 1], [], []>} : vector<16x128xf32>, vector<128x128xf32>, vector<16x128xf32> -> vector<16x128xf32>
    %c0_27 = arith.constant 0 : index
    %c0_28 = arith.constant 0 : index
    %39 = vector.load %arg9[%c0_27, %c0_28] : memref<1x128xf32, #tpu.memory_space<vmem>>, vector<1x128xf32>
    %40 = vector.broadcast %39 : vector<1x128xf32> to vector<16x128xf32>
    %41 = arith.addf %38, %40 : vector<16x128xf32>
    %c0_29 = arith.constant 0 : index
    %c0_30 = arith.constant 0 : index
    %42 = vector.load %arg10[%c0_29, %c0_30] : memref<128x128xf32, #tpu.memory_space<vmem>>, vector<128x128xf32>
    %cst_31 = arith.constant dense<0.000000e+00> : vector<16x128xf32>
    %43 = tpu.matmul %31, %42, %cst_31 {dimension_numbers = #tpu.dot_dimension_numbers<[1], [0], [0], [1], [0, 0, 1, 1], [], []>} : vector<16x128xf32>, vector<128x128xf32>, vector<16x128xf32> -> vector<16x128xf32>
    %c0_32 = arith.constant 0 : index
    %c0_33 = arith.constant 0 : index
    %44 = vector.load %arg11[%c0_32, %c0_33] : memref<1x128xf32, #tpu.memory_space<vmem>>, vector<1x128xf32>
    %45 = vector.broadcast %44 : vector<1x128xf32> to vector<16x128xf32>
    %46 = arith.addf %43, %45 : vector<16x128xf32>
    %cst_34 = arith.constant dense<0.000000e+00> : vector<16x16xf32>
    %47 = tpu.matmul %36, %41, %cst_34 {dimension_numbers = #tpu.dot_dimension_numbers<[1], [1], [0], [0], [0, 0, 1, 0], [], []>} : vector<16x128xf32>, vector<16x128xf32>, vector<16x16xf32> -> vector<16x16xf32>
    %cst_35 = arith.constant 0.0883883461 : f32
    %48 = vector.broadcast %cst_35 : f32 to vector<16x16xf32>
    %49 = arith.mulf %47, %48 : vector<16x16xf32>
    %50 = vector.broadcast %5 : vector<1x16xf32> to vector<16x16xf32>
    %51 = arith.mulf %50, %7 : vector<16x16xf32>
    %cst_36 = arith.constant 0.000000e+00 : f32
    %52 = vector.broadcast %cst_36 : f32 to vector<16x16xf32>
    %53 = arith.cmpf ogt, %51, %52 : vector<16x16xf32>
    %cst_37 = arith.constant dense<0.000000e+00> : vector<16xf32>
    %54 = vector.multi_reduction <add>, %51, %cst_37 [1] : vector<16x16xf32> to vector<16xf32>
    %55 = vector.shape_cast %54 : vector<16xf32> to vector<16x1xf32>
    %cst_38 = arith.constant 0.000000e+00 : f32
    %56 = vector.broadcast %cst_38 : f32 to vector<16x1xf32>
    %57 = arith.cmpf ogt, %55, %56 : vector<16x1xf32>
    %cst_39 = arith.constant -1.000000e+30 : f32
    %58 = vector.broadcast %cst_39 : f32 to vector<16x16xf32>
    %59 = arith.select %53, %49, %58 : vector<16x16xi1>, vector<16x16xf32>
    %cst_40 = arith.constant 0.000000e+00 : f32
    %60 = vector.shape_cast %57 : vector<16x1xi1> to vector<16x1xi1>
    %61 = vector.broadcast %60 : vector<16x1xi1> to vector<16x16xi1>
    %62 = vector.broadcast %cst_40 : f32 to vector<16x16xf32>
    %63 = arith.select %61, %59, %62 : vector<16x16xi1>, vector<16x16xf32>
    %cst_41 = arith.constant dense<0xFF800000> : vector<16xf32>
    %64 = vector.multi_reduction <maximumf>, %63, %cst_41 [1] : vector<16x16xf32> to vector<16xf32>
    %65 = vector.shape_cast %64 : vector<16xf32> to vector<16x1xf32>
    %66 = vector.broadcast %65 : vector<16x1xf32> to vector<16x16xf32>
    %67 = arith.subf %63, %66 : vector<16x16xf32>
    %68 = math.exp %67 : vector<16x16xf32>
    %cst_42 = arith.constant dense<0.000000e+00> : vector<16xf32>
    %69 = vector.multi_reduction <add>, %68, %cst_42 [1] : vector<16x16xf32> to vector<16xf32>
    %70 = vector.shape_cast %69 : vector<16xf32> to vector<16x1xf32>
    %71 = vector.broadcast %70 : vector<16x1xf32> to vector<16x16xf32>
    %72 = arith.divf %68, %71 : vector<16x16xf32>
    %cst_43 = arith.constant 0.000000e+00 : f32
    %73 = vector.shape_cast %57 : vector<16x1xi1> to vector<16x1xi1>
    %74 = vector.broadcast %73 : vector<16x1xi1> to vector<16x16xi1>
    %75 = vector.broadcast %cst_43 : f32 to vector<16x16xf32>
    %76 = arith.select %74, %72, %75 : vector<16x16xi1>, vector<16x16xf32>
    %77 = vector.broadcast %3 : vector<16x1xf32> to vector<16x16xf32>
    %78 = arith.mulf %76, %77 : vector<16x16xf32>
    %c0_44 = arith.constant 0 : index
    %c0_45 = arith.constant 0 : index
    %c0_46 = arith.constant 0 : index
    %79 = vector.load %arg5[%c0_44, %c0_45, %c0_46] : memref<1x16x16xf32, #tpu.memory_space<vmem>>, vector<1x16x16xf32>
    %80 = vector.shape_cast %79 : vector<1x16x16xf32> to vector<16x16xf32>
    %cst_47 = arith.constant dense<0.000000e+00> : vector<16x128xf32>
    %81 = tpu.matmul %80, %46, %cst_47 {dimension_numbers = #tpu.dot_dimension_numbers<[1], [0], [0], [1], [0, 0, 1, 1], [], []>} : vector<16x16xf32>, vector<16x128xf32>, vector<16x128xf32> -> vector<16x128xf32>
    %82 = arith.addf %1, %81 : vector<16x128xf32>
    %c0_48 = arith.constant 0 : index
    %c0_49 = arith.constant 0 : index
    %83 = vector.load %arg14[%c0_48, %c0_49] : memref<1x128xf32, #tpu.memory_space<vmem>>, vector<1x128xf32>
    %c0_50 = arith.constant 0 : index
    %c0_51 = arith.constant 0 : index
    %84 = vector.load %arg15[%c0_50, %c0_51] : memref<1x128xf32, #tpu.memory_space<vmem>>, vector<1x128xf32>
    %cst_52 = arith.constant dense<0.000000e+00> : vector<16xf32>
    %85 = vector.multi_reduction <add>, %82, %cst_52 [1] : vector<16x128xf32> to vector<16xf32>
    %86 = vector.shape_cast %85 : vector<16xf32> to vector<16x1xf32>
    %cst_53 = arith.constant 1.280000e+02 : f32
    %87 = vector.broadcast %cst_53 : f32 to vector<16x1xf32>
    %88 = arith.divf %86, %87 : vector<16x1xf32>
    %89 = arith.mulf %82, %82 : vector<16x128xf32>
    %cst_54 = arith.constant dense<0.000000e+00> : vector<16xf32>
    %90 = vector.multi_reduction <add>, %89, %cst_54 [1] : vector<16x128xf32> to vector<16xf32>
    %91 = vector.shape_cast %90 : vector<16xf32> to vector<16x1xf32>
    %cst_55 = arith.constant 1.280000e+02 : f32
    %92 = vector.broadcast %cst_55 : f32 to vector<16x1xf32>
    %93 = arith.divf %91, %92 : vector<16x1xf32>
    %94 = arith.mulf %88, %88 : vector<16x1xf32>
    %95 = arith.subf %93, %94 : vector<16x1xf32>
    %96 = vector.broadcast %88 : vector<16x1xf32> to vector<16x128xf32>
    %97 = arith.subf %82, %96 : vector<16x128xf32>
    %cst_56 = arith.constant 9.99999997E-7 : f32
    %98 = vector.broadcast %cst_56 : f32 to vector<16x1xf32>
    %99 = arith.addf %95, %98 : vector<16x1xf32>
    %100 = math.rsqrt %99 : vector<16x1xf32>
    %101 = vector.broadcast %100 : vector<16x1xf32> to vector<16x128xf32>
    %102 = arith.mulf %97, %101 : vector<16x128xf32>
    %103 = vector.broadcast %83 : vector<1x128xf32> to vector<16x128xf32>
    %104 = arith.mulf %102, %103 : vector<16x128xf32>
    %105 = vector.broadcast %84 : vector<1x128xf32> to vector<16x128xf32>
    %106 = arith.addf %104, %105 : vector<16x128xf32>
    %c0_57 = arith.constant 0 : index
    %c0_58 = arith.constant 0 : index
    %107 = vector.load %arg16[%c0_57, %c0_58] : memref<128x128xf32, #tpu.memory_space<vmem>>, vector<128x128xf32>
    %cst_59 = arith.constant dense<0.000000e+00> : vector<16x128xf32>
    %108 = tpu.matmul %106, %107, %cst_59 {dimension_numbers = #tpu.dot_dimension_numbers<[1], [0], [0], [1], [0, 0, 1, 1], [], []>} : vector<16x128xf32>, vector<128x128xf32>, vector<16x128xf32> -> vector<16x128xf32>
    %c0_60 = arith.constant 0 : index
    %c0_61 = arith.constant 0 : index
    %109 = vector.load %arg17[%c0_60, %c0_61] : memref<1x128xf32, #tpu.memory_space<vmem>>, vector<1x128xf32>
    %110 = vector.broadcast %109 : vector<1x128xf32> to vector<16x128xf32>
    %111 = arith.addf %108, %110 : vector<16x128xf32>
    %112 = arith.addf %82, %111 : vector<16x128xf32>
    %c0_62 = arith.constant 0 : index
    %c0_63 = arith.constant 0 : index
    %c0_64 = arith.constant 0 : index
    %113 = vector.load %arg18[%c0_62, %c0_63, %c0_64] : memref<1x16x128xf32, #tpu.memory_space<vmem>>, vector<1x16x128xf32>
    %114 = vector.shape_cast %113 : vector<1x16x128xf32> to vector<16x128xf32>
    %115 = vector.shape_cast %112 : vector<16x128xf32> to vector<1x16x128xf32>
    tpu.vector_store %arg18[%c0_62, %c0_63, %c0_64], %115 {strides = array<i32>} : memref<1x16x128xf32, #tpu.memory_space<vmem>>, vector<1x16x128xf32>,
    %c0_65 = arith.constant 0 : index
    %c0_66 = arith.constant 0 : index
    %c0_67 = arith.constant 0 : index
    %116 = vector.load %arg19[%c0_65, %c0_66, %c0_67] : memref<1x16x16xf32, #tpu.memory_space<vmem>>, vector<1x16x16xf32>
    %117 = vector.shape_cast %116 : vector<1x16x16xf32> to vector<16x16xf32>
    %118 = vector.shape_cast %78 : vector<16x16xf32> to vector<1x16x16xf32>
    tpu.vector_store %arg19[%c0_65, %c0_66, %c0_67], %118 {strides = array<i32>} : memref<1x16x16xf32, #tpu.memory_space<vmem>>, vector<1x16x16xf32>,
    return
  }
  func.func @transform_0(%arg0: i32) -> (i32, i32, i32) {
    %c0_i32 = arith.constant 0 : i32
    %c0_i32_0 = arith.constant 0 : i32
    %c0_i32_1 = arith.constant 0 : i32
    return %arg0, %c0_i32, %c0_i32_0 : i32, i32, i32
  }
  func.func @transform_1(%arg0: i32) -> (i32, i32, i32) {
    %c0_i32 = arith.constant 0 : i32
    %c0_i32_0 = arith.constant 0 : i32
    %c0_i32_1 = arith.constant 0 : i32
    return %arg0, %c0_i32, %c0_i32_0 : i32, i32, i32
  }
  func.func @transform_2(%arg0: i32) -> (i32, i32, i32) {
    %c0_i32 = arith.constant 0 : i32
    %c0_i32_0 = arith.constant 0 : i32
    %c0_i32_1 = arith.constant 0 : i32
    return %arg0, %c0_i32, %c0_i32_0 : i32, i32, i32
  }
  func.func @transform_3(%arg0: i32) -> (i32, i32, i32) {
    %c0_i32 = arith.constant 0 : i32
    %c0_i32_0 = arith.constant 0 : i32
    %c0_i32_1 = arith.constant 0 : i32
    return %arg0, %c0_i32, %c0_i32_0 : i32, i32, i32
  }
  func.func @transform_4(%arg0: i32) -> (i32, i32, i32) {
    %c0_i32 = arith.constant 0 : i32
    %c0_i32_0 = arith.constant 0 : i32
    %c0_i32_1 = arith.constant 0 : i32
    return %arg0, %c0_i32, %c0_i32_0 : i32, i32, i32
  }
  func.func @transform_5(%arg0: i32) -> (i32, i32) {
    %c0_i32 = arith.constant 0 : i32
    %c0_i32_0 = arith.constant 0 : i32
    %c0_i32_1 = arith.constant 0 : i32
    return %c0_i32, %c0_i32_0 : i32, i32
  }
  func.func @transform_6(%arg0: i32) -> (i32, i32) {
    %c0_i32 = arith.constant 0 : i32
    %c0_i32_0 = arith.constant 0 : i32
    %c0_i32_1 = arith.constant 0 : i32
    return %c0_i32, %c0_i32_0 : i32, i32
  }
  func.func @transform_7(%arg0: i32) -> (i32, i32) {
    %c0_i32 = arith.constant 0 : i32
    %c0_i32_0 = arith.constant 0 : i32
    %c0_i32_1 = arith.constant 0 : i32
    return %c0_i32, %c0_i32_0 : i32, i32
  }
  func.func @transform_8(%arg0: i32) -> (i32, i32) {
    %c0_i32 = arith.constant 0 : i32
    %c0_i32_0 = arith.constant 0 : i32
    %c0_i32_1 = arith.constant 0 : i32
    return %c0_i32, %c0_i32_0 : i32, i32
  }
  func.func @transform_9(%arg0: i32) -> (i32, i32) {
    %c0_i32 = arith.constant 0 : i32
    %c0_i32_0 = arith.constant 0 : i32
    %c0_i32_1 = arith.constant 0 : i32
    return %c0_i32, %c0_i32_0 : i32, i32
  }
  func.func @transform_10(%arg0: i32) -> (i32, i32) {
    %c0_i32 = arith.constant 0 : i32
    %c0_i32_0 = arith.constant 0 : i32
    %c0_i32_1 = arith.constant 0 : i32
    return %c0_i32, %c0_i32_0 : i32, i32
  }
  func.func @transform_11(%arg0: i32) -> (i32, i32) {
    %c0_i32 = arith.constant 0 : i32
    %c0_i32_0 = arith.constant 0 : i32
    %c0_i32_1 = arith.constant 0 : i32
    return %c0_i32, %c0_i32_0 : i32, i32
  }
  func.func @transform_12(%arg0: i32) -> (i32, i32) {
    %c0_i32 = arith.constant 0 : i32
    %c0_i32_0 = arith.constant 0 : i32
    %c0_i32_1 = arith.constant 0 : i32
    return %c0_i32, %c0_i32_0 : i32, i32
  }
  func.func @transform_13(%arg0: i32) -> (i32, i32) {
    %c0_i32 = arith.constant 0 : i32
    %c0_i32_0 = arith.constant 0 : i32
    %c0_i32_1 = arith.constant 0 : i32
    return %c0_i32, %c0_i32_0 : i32, i32
  }
  func.func @transform_14(%arg0: i32) -> (i32, i32) {
    %c0_i32 = arith.constant 0 : i32
    %c0_i32_0 = arith.constant 0 : i32
    %c0_i32_1 = arith.constant 0 : i32
    return %c0_i32, %c0_i32_0 : i32, i32
  }
  func.func @transform_15(%arg0: i32) -> (i32, i32) {
    %c0_i32 = arith.constant 0 : i32
    %c0_i32_0 = arith.constant 0 : i32
    %c0_i32_1 = arith.constant 0 : i32
    return %c0_i32, %c0_i32_0 : i32, i32
  }
  func.func @transform_16(%arg0: i32) -> (i32, i32) {
    %c0_i32 = arith.constant 0 : i32
    %c0_i32_0 = arith.constant 0 : i32
    %c0_i32_1 = arith.constant 0 : i32
    return %c0_i32, %c0_i32_0 : i32, i32
  }
  func.func @transform_17(%arg0: i32) -> (i32, i32, i32) {
    %c0_i32 = arith.constant 0 : i32
    %c0_i32_0 = arith.constant 0 : i32
    %c0_i32_1 = arith.constant 0 : i32
    return %arg0, %c0_i32, %c0_i32_0 : i32, i32, i32
  }
  func.func @transform_18(%arg0: i32) -> (i32, i32, i32) {
    %c0_i32 = arith.constant 0 : i32
    %c0_i32_0 = arith.constant 0 : i32
    %c0_i32_1 = arith.constant 0 : i32
    return %arg0, %c0_i32, %c0_i32_0 : i32, i32, i32
  }
}

</mosaic_0001>

<bundles_post_ra>
// kernel: tpu_custom_call.1
= control target key start
LH: loop header
LB: loop body
LE: loop exit
PB: predicated region body
PF: predicated region fallthrough
CT: control target
= control target key end

     0   :  { %s2924_s0 = inlined_call_operand.vmem [shape: f32[2,16,128], index: 0, kind: input, shape index: {}]   ;;  %s2925_s1 = inlined_call_operand.vmem [shape: f32[2,16,1], index: 1, kind: input, shape index: {}]   ;;  %s2926_s2 = inlined_call_operand.vmem [shape: f32[2,1,16], index: 2, kind: input, shape index: {}]   ;;  %s2927_s3 = inlined_call_operand.hbm [shape: f32[2,16,16], index: 3, kind: input, shape index: {}]   ;;  %s2928_s4 = inlined_call_operand.hbm [shape: f32[2,16,16], index: 4, kind: input, shape index: {}]   ;;  %s2929_s5 = inlined_call_operand.hbm [shape: f32[128,128], index: 5, kind: input, shape index: {}]   ;;  %s2930_s6 = inlined_call_operand.vmem [shape: f32[1,128], index: 6, kind: input, shape index: {}]   ;;  %s2931_s7 = inlined_call_operand.hbm [shape: f32[128,128], index: 7, kind: input, shape index: {}]   ;;  %s2932_s8 = inlined_call_operand.vmem [shape: f32[1,128], index: 8, kind: input, shape index: {}]   ;;  %s2933_s9 = inlined_call_operand.hbm [shape: f32[128,128], index: 9, kind: input, shape index: {}]   ;;  %s2934_s10 = inlined_call_operand.vmem [shape: f32[1,128], index: 10, kind: input, shape index: {}]   ;;  %s2935_s11 = inlined_call_operand.vmem [shape: f32[1,128], index: 11, kind: input, shape index: {}]   ;;  %s2936_s12 = inlined_call_operand.vmem [shape: f32[1,128], index: 12, kind: input, shape index: {}]   ;;  %s2937_s13 = inlined_call_operand.vmem [shape: f32[1,128], index: 13, kind: input, shape index: {}]   ;;  %s2938_s14 = inlined_call_operand.vmem [shape: f32[1,128], index: 14, kind: input, shape index: {}]   ;;  %s2939_s15 = inlined_call_operand.hbm [shape: f32[128,128], index: 15, kind: input, shape index: {}]   ;;  %s2940_s16 = inlined_call_operand.vmem [shape: f32[1,128], index: 16, kind: input, shape index: {}]   ;;  %s2941_s17 = inlined_call_operand.hbm [shape: f32[2,16,128], index: 17, kind: output, shape index: {0}]   ;;  %s2942_s18 = inlined_call_operand.hbm [shape: f32[2,16,16], index: 18, kind: output, shape index: {1}]  }
   0x1   :  { %2957 = sst [smem:[#allocation28_spill]] %s2924_s0 }
   0x2   :  { %2958 = sst [smem:[#allocation29_spill]] %s2925_s1 }
   0x3   :  { %2959 = sst [smem:[#allocation30_spill]] %s2926_s2 }
   0x4   :  { %2960 = sst [smem:[#allocation31_spill]] %s2927_s3 }
   0x5   :  { %2961 = sst [smem:[#allocation32_spill]] %s2929_s5 }
   0x6   :  { %2962 = sst [smem:[#allocation33_spill]] %s2931_s7 }
   0x7   :  { %2963 = sst [smem:[#allocation34_spill]] %s2933_s9 }
   0x8   :  { %2964 = sst [smem:[#allocation35_spill]] %s2939_s15 }
   0x9   :  { %2965 = sst [smem:[#allocation36_spill]] %s2941_s17 }
   0xa   :  { %2966 = sst [smem:[#allocation37_spill]] %s2942_s18 }
   0xb   :  { %24 = vsyncpa [#allocation3], 0 }
   0xc   :  { %26 = vsyncpa [#allocation3 + $0x1], 0 }
   0xd   :  { %27 = vsyncpa [#allocation6], 0 }
   0xe   :  { %29 = vsyncpa [#allocation6 + $0x1], 0 }
   0xf   :  { %30 = vsyncpa [#allocation9], 0 }
  0x10   :  { %31 = vsyncpa [#allocation12], 0 }
  0x11   :  { %32 = vsyncpa [#allocation4], 0 }
  0x12   :  { %34 = vsyncpa [#allocation4 + $0x1], 0 }
  0x13   :  { %35 = vsyncpa [#allocation15], 0 }
  0x14   :  { %37 = vsyncpa [#allocation15 + $0x1], 0  ;;  %s2495_s27 = smov 0   ;;  %s2497_s28 = smov 0  }
  0x15   :  { %s2499_s29 = smov 0   ;;  %s2501_s30 = smov 0  }
  0x16 LB: > { %2967 = sst [smem:[#allocation23_spill]] %s2373_s27  ;;  %s2516_s0 = sadd.s32 4294967295, %s2385_s30   ;;  %s2385_s30 = sphi %s2501_s30, %s3002_s30   ;;  %s2381_s29 = sphi %s2499_s29, %s3004_s29   ;;  %s2377_s28 = sphi %s2497_s28, %s3006_s28   ;;  %s2373_s27 = sphi %s2495_s27, %s3005_s27  }
  0x17   : > { %2968 = sst [smem:[#allocation24_spill]] %s2381_s29  ;;  %s1710_s19 = sadd.s32 4294967294, %s2385_s30  }
  0x18   : > { %p141_p0 = scmp.ne.s32.totalorder %s2377_s28, %s2373_s27  ;;  %p2947_p1 = scmp.eq.s32.totalorder %s2516_s0, 0 }
  0x19   : > { %p443_p2 = scmp.eq.s32.totalorder %s2516_s0, 1  ;;  %p449_p3 = scmp.eq.s32.totalorder %s1710_s19, 1 }
  0x1a   : > { %p2525_p4 = por %p2947_p1, %p141_p0  ;;  %p1711_p5 = scmp.ge.s32.totalorder %s2385_s30, 1 }
  0x1b   : > { %p2530_p6 = por %p449_p3, %p141_p0  ;;  %p482_p7 = scmp.lt.s32.totalorder %s2385_s30, 3 }
  0x1c   : > { %s2969_s1 = scalar_select %p2525_p4, 1, 0 }
  0x1d   : > { %s2970_s20 = scalar_select %p2530_p6, 1, 0 }
  0x1e   : > { %p2535_p8 = pnand %p1711_p5, %p482_p7  ;;  %s2387_s22 = smov [#allocation7]  }
  0x1f   : > { %2971 = sst [smem:[#allocation25_spill]] %s2970_s20  ;;  %s494_s2 = sshll.u32 %s2387_s22, 4  ;;  %s495_s2 = int_to_ptr.vmem [resolvable:$true] %s494_s2 }
  0x20   : > { %p2019_p9 = pneg %p2535_p8  ;;  %s2388_s24 = smov [#allocation8]  }
  0x21   : > { %s510_s25 = sshll.u32 %s2388_s24, 4  ;;  %s2389_s26 = smov [#allocation10]   ;;  %s511_s25 = int_to_ptr.vmem [resolvable:$true] %s510_s25 }
  0x22   : > { %p2544_p11 = pnand %p2019_p9, %p2947_p1  ;;  %s526_s19 = sshll.u32 %s2389_s26, 4  ;;  %s527_s19 = int_to_ptr.vmem [resolvable:$true] %s526_s19 }
  0x23   : > { %s2126_s20 = scalar_lea.vmem %s495_s2, 2048  ;;  %p2134_p5 = scmp.lt.s32.totalorder %s495_s2, %s495_s2 }
  0x24   : > { %p2117_p12 = pneg %p2544_p11  ;;  %p2127_p13 = scmp.ne.s32.totalorder %s495_s2, %s2126_s20 }
  0x25   : > { %p2135_p7 = scmp.lt.s32.totalorder %s2126_s20, %s2126_s20 }
  0x26   : > { %p2129_p0 = pnand %p2127_p13, %p2117_p12 }
  0x27   : > { %p2136_p9 = por %p2135_p7, %p2134_p5 }
  0x28   : > { %p2130_p3 = pneg %p2129_p0 }
  0x2a   : > { %p2137_p10 = pnand %p2136_p9, %p2130_p3 }
  0x2c   : > { %2140 = shalt.err (!%p2137_p10)
}
  0x2d   : > { %s2948_s22 = smov 128   ;;  %s2950_s24 = smov 8  }
  0x2e   : > { %s2974_s5 = sld [smem:[#allocation32_spill]]  ;;  %s2152_s18 = scalar_lea.vmem %s511_s25, 2048 }
  0x2f   : > { %p2153_p13 = scmp.ne.s32.totalorder %s511_s25, %s2152_s18  ;;  %p2160_p3 = scmp.lt.s32.totalorder %s511_s25, %s511_s25 }
  0x30   : > { %p2161_p10 = scmp.lt.s32.totalorder %s2152_s18, %s2152_s18 }
  0x31   : > { %p2155_p0 = pnand %p2153_p13, %p2117_p12 }
  0x32   : > { %p2162_p7 = por %p2161_p10, %p2160_p3 }
  0x33   : > { %p2156_p5 = pneg %p2155_p0 }
  0x34   : > { %2022 = dma.hbm_to_vmem [thread:$0]  (!%p2544_p11), %s2974_s5, 2048, %s495_s2, [#allocation6], %s2948_s22, %s2948_s22, %s2950_s24  }
  0x35   : > { %p2163_p9 = pnand %p2162_p7, %p2156_p5 }
  0x37   : > { %2166 = shalt.err (!%p2163_p9)
}
  0x38   : > { %s2975_s7 = sld [smem:[#allocation33_spill]]  ;;  %s2178_s27 = scalar_lea.vmem %s527_s19, 2048 }
  0x39   : > { %p2179_p1 = scmp.ne.s32.totalorder %s527_s19, %s2178_s27  ;;  %p2186_p3 = scmp.lt.s32.totalorder %s527_s19, %s527_s19 }
  0x3a   : > { %p2187_p5 = scmp.lt.s32.totalorder %s2178_s27, %s2178_s27 }
  0x3b   : > { %p2181_p13 = pnand %p2179_p1, %p2117_p12 }
  0x3c   : > { %p2188_p10 = por %p2187_p5, %p2186_p3 }
  0x3d   : > { %p2182_p0 = pneg %p2181_p13 }
  0x3e   : > { %2025 = dma.hbm_to_vmem [thread:$0]  (!%p2544_p11), %s2975_s7, 2048, %s511_s25, [#allocation9], %s2948_s22, %s2948_s22, %s2950_s24  }
  0x3f   : > { %p2189_p7 = pnand %p2188_p10, %p2182_p0 }
  0x41   : > { %2192 = shalt.err (!%p2189_p7)
}
  0x42   : > { %s2976_s9 = sld [smem:[#allocation34_spill]]  ;;  %s2392_s2 = smov [#allocation11]  }
  0x43   : > { %s554_s25 = sshll.u32 %s2392_s2, 4  ;;  %s555_s25 = int_to_ptr.vmem [resolvable:$true] %s554_s25 }
  0x44   : > { %s2204_s26 = scalar_lea.vmem %s555_s25, 2048  ;;  %p2212_p0 = scmp.lt.s32.totalorder %s555_s25, %s555_s25 }
  0x45   : > { %p2205_p1 = scmp.ne.s32.totalorder %s555_s25, %s2204_s26  ;;  %p2213_p3 = scmp.lt.s32.totalorder %s2204_s26, %s2204_s26 }
  0x47   : > { %p2207_p9 = pnand %p2205_p1, %p2117_p12  ;;  %p2214_p5 = por %p2213_p3, %p2212_p0 }
  0x48   : > { %2028 = dma.hbm_to_vmem [thread:$0]  (!%p2544_p11), %s2976_s9, 2048, %s527_s19, [#allocation9], %s2948_s22, %s2948_s22, %s2950_s24  }
  0x49   : > { %p2208_p13 = pneg %p2207_p9 }
  0x4b   : > { %p2215_p10 = pnand %p2214_p5, %p2208_p13 }
  0x4d   : > { %2218 = shalt.err (!%p2215_p10)
}
  0x4e   : > { %s2977_s15 = sld [smem:[#allocation35_spill]]  ;;  %s2595_s27 = sadd.s32 1, %s2385_s30  }
  0x4f   : > { %2978 = sst [smem:[#allocation26_spill]] %s2595_s27  ;;  %s128_s23 = sadd.s32 1, %s2381_s29 }
  0x50   : > { %s125_s17 = ssub.s32 %s2385_s30, %s2595_s27  ;;  %p135_p12 = scmp.ne.s32.totalorder %s2381_s29, %s2377_s28 }
  0x51   : > { %p126_p7 = scmp.eq.s32.totalorder %s125_s17, 0  ;;  %p136_p1 = scmp.eq.s32.totalorder %s2385_s30, 0 }
  0x52   : > { %p2605_p9 = por %p443_p2, %p135_p12  ;;  %p2050_p13 = scmp.lt.s32.totalorder %s2385_s30, 2 }
  0x53   : > { %s2611_s2 = scalar_select %p126_p7, %s2381_s29, %s128_s23  }
  0x54   : > { %2031 = dma.hbm_to_vmem [thread:$0]  (!%p2544_p11), %s2977_s15, 2048, %s555_s25, [#allocation12], %s2948_s22, %s2948_s22, %s2950_s24  }
  0x55   : > { %s2979_s18 = scalar_select %p2605_p9, 1, 0 }
  0x56   : > { %2980 = sst [smem:[#allocation27_spill]] %s2611_s2  ;;  %p137_p0 = por %p136_p1, %p135_p12 }
  0x57   : > { %s593_s26 = sand.u32 1, %s2381_s29   ;;  %s1755_s25 = sshll.u32 %s2385_s30, 8 }
  0x58   : > { %s1717_s19 = sshll.u32 %s593_s26, 4  ;;  %s2981_s3 = sld [smem:[#allocation31_spill]] }
  0x59   : > { %s597_s17 = scalar_lea.vmem [#allocation2], %s1717_s19  ;;  %p2622_p2 = pnand %p2050_p13, %p137_p0 }
  0x5a   : > { %s604_s5 = sshll.u32 %s597_s17, 4  ;;  %s2629_s15 = scalar_lea.hbm %s2928_s4, %s1755_s25  ;;  %s2620_s5 = int_to_ptr.vmem [resolvable:$true] %s604_s5 }
  0x5b   : > { %s618_s22 = scalar_lea.vmem [#allocation5], %s1717_s19  ;;  %s2633_s2 = scalar_lea.sflag [#allocation3], %s593_s26 }
  0x5c   : > { %s2631_s20 = sshll.u32 %s618_s22, 4  ;;  %p2221_p3 = pneg %p2622_p2  ;;  %s2664_s20 = int_to_ptr.vmem [resolvable:$true] %s2631_s20 }
  0x5e   : > { %s2618_s24 = scalar_lea.hbm %s2981_s3, %s1755_s25  ;;  %s2224_s9 = scalar_lea.hbm %s2981_s3, 512 }
  0x5f   : > { %s2219_s29 = scalar_lea.hbm %s2618_s24, 256  ;;  %p2225_p12 = scmp.lt.s32.totalorder %s2618_s24, %s2981_s3 }
  0x60   : > { %p2220_p11 = scmp.ne.s32.totalorder %s2618_s24, %s2219_s29  ;;  %p2226_p7 = scmp.lt.s32.totalorder %s2224_s9, %s2219_s29 }
  0x62   : > { %p2222_p5 = pnand %p2221_p3, %p2220_p11  ;;  %p2227_p1 = por %p2226_p7, %p2225_p12 }
  0x64   : > { %p2223_p10 = pneg %p2222_p5 }
  0x66   : > { %p2228_p13 = pnand %p2227_p1, %p2223_p10 }
  0x68   : > { %2231 = shalt.err (!%p2228_p13)
}
  0x69   : > { %s2232_s26 = scalar_lea.vmem %s2620_s5, 256  ;;  %s2393_s27 = smov [#allocation2]  }
  0x6a   : > { %p2233_p0 = scmp.ne.s32.totalorder %s2620_s5, %s2232_s26  ;;  %s2237_s19 = sshll.u32 %s2393_s27, 4  ;;  %s2238_s19 = int_to_ptr.vmem [resolvable:$false] %s2237_s19 }
  0x6b   : > { %s2239_s22 = scalar_lea.vmem %s2238_s19, 512  ;;  %p2240_p6 = scmp.lt.s32.totalorder %s2620_s5, %s2238_s19 }
  0x6c   : > { %p2235_p11 = pnand %p2233_p0, %p2221_p3  ;;  %p2241_p9 = scmp.lt.s32.totalorder %s2239_s22, %s2232_s26 }
  0x6e   : > { %p2236_p5 = pneg %p2235_p11  ;;  %p2242_p4 = por %p2241_p9, %p2240_p6 }
  0x70   : > { %p2243_p12 = pnand %p2242_p4, %p2236_p5 }
  0x72   : > { %2246 = shalt.err (!%p2243_p12)
}
  0x73   : > { %s2983_s29 = smov 8   ;;  %s2984_s17 = smov 128  }
  0x74   : > { %2035 = dma.hbm_to_vmem [thread:$0]  (!%p2622_p2), %s2618_s24, 256, %s2620_s5, %s2633_s2, %s2984_s17, %s2984_s17, %s2983_s29  }
  0x75   : > { %s614_s9 = sand.u32 1, %s2385_s30   ;;  %s2247_s25 = scalar_lea.hbm %s2629_s15, 256 }
  0x76   : > { %s615_s23 = scalar_lea.sflag [#allocation6], %s614_s9  ;;  %p2248_p4 = scmp.ne.s32.totalorder %s2629_s15, %s2247_s25 }
  0x77   : > { %s2252_s19 = scalar_lea.hbm %s2928_s4, 512  ;;  %p2253_p10 = scmp.lt.s32.totalorder %s2629_s15, %s2928_s4 }
  0x78   : > { %p2250_p6 = pnand %p2248_p4, %p2221_p3  ;;  %p2254_p7 = scmp.lt.s32.totalorder %s2252_s19, %s2247_s25 }
  0x7a   : > { %p2251_p9 = pneg %p2250_p6  ;;  %p2255_p1 = por %p2254_p7, %p2253_p10 }
  0x7c   : > { %p2256_p13 = pnand %p2255_p1, %p2251_p9 }
  0x7e   : > { %2259 = shalt.err (!%p2256_p13)
}
  0x7f   : > { %s2260_s5 = scalar_lea.vmem %s2664_s20, 256  ;;  %s2394_s24 = smov [#allocation5]  }
  0x80   : > { %p2261_p0 = scmp.ne.s32.totalorder %s2664_s20, %s2260_s5  ;;  %s2265_s2 = sshll.u32 %s2394_s24, 4  ;;  %s2266_s2 = int_to_ptr.vmem [resolvable:$false] %s2265_s2 }
  0x81   : > { %s2267_s9 = scalar_lea.vmem %s2266_s2, 512  ;;  %p2268_p12 = scmp.lt.s32.totalorder %s2664_s20, %s2266_s2 }
  0x82   : > { %p2263_p11 = pnand %p2261_p0, %p2221_p3  ;;  %p2269_p4 = scmp.lt.s32.totalorder %s2267_s9, %s2260_s5 }
  0x84   : > { %p2264_p5 = pneg %p2263_p11  ;;  %p2270_p6 = por %p2269_p4, %p2268_p12 }
  0x86   : > { %p2271_p10 = pnand %p2270_p6, %p2264_p5 }
  0x88   : > { %2274 = shalt.err (!%p2271_p10)
}
  0x89   : > { %2038 = dma.hbm_to_vmem [thread:$0]  (!%p2622_p2), %s2629_s15, 256, %s2664_s20, %s615_s23, %s2984_s17, %s2984_s17, %s2983_s29  }
  0x8a   : > { %637 = sbr.rel (%p2535_p8) target bundleno = 1239 (0x4d7), region = 88  ;;  %s2695_s3 = sand.u32 (!%p2535_p8), 1, %s2377_s28  }
  0x8b   : > { %s2698_s25 = sshll.u32 (!%p2535_p8), %s2695_s3, 4  ;;  %s640_s26 = scalar_lea.sflag (!%p2535_p8), [#allocation3], %s2695_s3 }
  0x8c   : > { %s643_s7 = scalar_lea.vmem (!%p2535_p8), [#allocation2], %s2698_s25  ;;  %p2985_p3 = scmp.ne.s32.totalorder (!%p2535_p8), %s2969_s1, 0 }
  0x8f   : > { %2344 = dma.done.wait (%p2985_p3), %s640_s26, 256  }
  0x90   : > { %2346 = vsyncadd (%p2985_p3), %s640_s26, 4294967040  ;;  %s648_s15 = sand.u32 1, %s2516_s0   ;;  %s652_s20 = scalar_lea.vmem [#allocation5], %s2698_s25 }
  0x91   : > { %s649_s21 = scalar_lea.sflag [#allocation6], %s648_s15 }
  0x92   : > { %2348 = dma.done.wait (%p2985_p3), %s649_s21, 256  }
  0x93   : > { %2350 = vsyncadd (%p2985_p3), %s649_s21, 4294967040  ;;  %p2986_p8 = scmp.eq.s32.totalorder %s2516_s0, 0 }
  0x95   : > { %2352 = dma.done.wait (%p2986_p8), [#allocation6], 2048   ;;  %p2987_p2 = pmov %p2986_p8 }
  0x97   : > { %2354 = vsyncadd (%p2987_p2), [#allocation6], 4294965248  ;;  %p2988_p9 = pmov %p2987_p2 }
  0x98   : > { %p2989_p7 = pmov %p2987_p2 }
  0x99   : > { %2356 = dma.done.wait (%p2988_p9), [#allocation9], 4096  }
  0x9a   : > { %2358 = vsyncadd (%p2989_p7), [#allocation9], 4294963200  ;;  %p2990_p1 = pmov %p2987_p2 }
  0x9c   : > { %2360 = dma.done.wait (%p2990_p1), [#allocation12], 2048   ;;  %p2991_p13 = pmov %p2990_p1 }
  0x9d   : > { %p744_p0 = scmp.lt.s32.totalorder %s2516_s0, 1  ;;  %s2992_s27 = sld [smem:[#allocation28_spill]]  ;;  %v824_v2 = vld [vmem:[#allocation7 + $0x78] sm:$0xff]  ;;  %v823_v6 = vld [vmem:[#allocation7 + $0x70] sm:$0xff]  ;;  %v822_v8 = vld [vmem:[#allocation7 + $0x68] sm:$0xff]  ;;  %vm1190_vm0 = vcmask 130048  }
  0x9e   : > { %2362 = vsyncadd (%p2991_p13), [#allocation12], 4294965248  ;;  %1841 = vmatprep.subr.mxu0 %v824_v2  ;;  %v922_v5 = vld [vmem:[#allocation8 + $0x78] sm:$0xff]  ;;  %v921_v7 = vld [vmem:[#allocation8 + $0x70] sm:$0xff]  ;;  %s2993_s22 = sld [smem:[#allocation30_spill]]  ;;  %p2996_p5 = scmp.ne.s32.totalorder %s2979_s18, 0 }
  0x9f   : > { %s2726_s1 = scalar_select %p744_p0, %s2516_s0, 1  ;;  %1842 = vmatpush3.msra.mxu0 %v824_v2  ;;  %1876 = vmatprep.subr.mxu1 %v922_v5  ;;  %v920_v9 = vld [vmem:[#allocation8 + $0x68] sm:$0xff]  ;;  %v821_v10 = vld [vmem:[#allocation7 + $0x60] sm:$0xff]  ;;  %v820_v12 = vld [vmem:[#allocation7 + $0x58] sm:$0xff] }
  0xa0   : > { %1843 = vmatprep.subr.mxu0 %v823_v6  ;;  %1877 = vmatpush3.msra.mxu1 %v922_v5  ;;  %v919_v11 = vld [vmem:[#allocation8 + $0x60] sm:$0xff]  ;;  %v918_v13 = vld [vmem:[#allocation8 + $0x58] sm:$0xff]  ;;  %v819_v14 = vld [vmem:[#allocation7 + $0x50] sm:$0xff]  ;;  %s2994_s15 = sld [smem:[#allocation29_spill]]  ;;  %s2396_s2 = smov [#allocation13]  }
  0xa1   : > { %s1757_s29 = sshll.u32 %s2726_s1, 4  ;;  %1844 = vmatpush3.msra.mxu0 %v823_v6  ;;  %1878 = vmatprep.subr.mxu1 %v921_v7  ;;  %v917_v15 = vld [vmem:[#allocation8 + $0x50] sm:$0xff]  ;;  %v818_v16 = vld [vmem:[#allocation7 + $0x48] sm:$0xff]  ;;  %v817_v18 = vld [vmem:[#allocation7 + $0x40] sm:$0xff]  ;;  %s2279_s9 = sshll.u32 %s2396_s2, 4  ;;  %s2280_s9 = int_to_ptr.vmem [resolvable:$false] %s2279_s9 }
  0xa2   : > { %1845 = vmatprep.subr.mxu0 %v822_v8  ;;  %1879 = vmatpush3.msra.mxu1 %v921_v7  ;;  %v916_v17 = vld [vmem:[#allocation8 + $0x48] sm:$0xff]  ;;  %v915_v19 = vld [vmem:[#allocation8 + $0x40] sm:$0xff]  ;;  %v816_v20 = vld [vmem:[#allocation7 + $0x38] sm:$0xff]  ;;  %s2281_s26 = scalar_lea.vmem %s2280_s9, 512 }
  0xa3   : > { %s748_s19 = scalar_lea.vmem %s2992_s27, %s1757_s29  ;;  %1846 = vmatpush3.msra.mxu0 %v822_v8  ;;  %1880 = vmatprep.subr.mxu1 %v920_v9  ;;  %v914_v21 = vld [vmem:[#allocation8 + $0x38] sm:$0xff]  ;;  %v815_v22 = vld [vmem:[#allocation7 + $0x30] sm:$0xff]  ;;  %v814_v24 = vld [vmem:[#allocation7 + $0x28] sm:$0xff]  ;;  %s736_s27 = scalar_lea.vmem [#allocation13], %s2698_s25 }
  0xa4   : > { %v2734_v0 = vld [vmem:[%s748_s19] sm:$0xff]  ;;  %v2736_v1 = vld [vmem:[%s748_s19 + $0x8] sm:$0xff]  ;;  %1847 = vmatprep.subr.mxu0 %v821_v10  ;;  %1881 = vmatpush3.msra.mxu1 %v920_v9  ;;  %v913_v23 = vld [vmem:[#allocation8 + $0x30] sm:$0xff]  ;;  %s756_s5 = scalar_lea.vmem %s2993_s22, %s2726_s1  ;;  %s1495_s19 = sshll.u32 %s736_s27, 4  ;;  %s2830_s19 = int_to_ptr.vmem [resolvable:$true] %s1495_s19 }
  0xa5   : > { %766 = vadd.xlane.f32.xlu0 %v2734_v0  ;;  %v773_v3 = vmul.f32 %v2734_v0, %v2734_v0  ;;  %v774_v4 = vmul.f32 %v2736_v1, %v2736_v1  ;;  %1848 = vmatpush3.msra.mxu0 %v821_v10  ;;  %v912_v25 = vld [vmem:[#allocation8 + $0x28] sm:$0xff]  ;;  %v813_v26 = vld [vmem:[#allocation7 + $0x20] sm:$0xff]  ;;  %v812_v28 = vld [vmem:[#allocation7 + $0x18] sm:$0xff]  ;;  %s1759_s1 = sshll.u32 %s2516_s0, 8  ;;  %s2275_s24 = scalar_lea.vmem %s2830_s19, 256 }
  0xa6   : > { %1882 = vmatprep.subr.mxu1 %v919_v11  ;;  %1849 = vmatprep.subr.mxu0 %v820_v12  ;;  %v911_v27 = vld [vmem:[#allocation8 + $0x20] sm:$0xff]  ;;  %v910_v29 = vld [vmem:[#allocation8 + $0x18] sm:$0xff]  ;;  %v811_v30 = vld [vmem:[#allocation7 + $0x10] sm:$0xff]  ;;  %s753_s21 = scalar_lea.vmem %s2994_s15, %s1757_s29  ;;  %p2276_p11 = scmp.ne.s32.totalorder %s2830_s19, %s2275_s24 }
  0xa7   : > { %775 = vadd.xlane.f32.xlu1 %v773_v3  ;;  %1883 = vmatpush3.msra.mxu1 %v919_v11  ;;  %v909_v31 = vld [vmem:[#allocation8 + $0x10] sm:$0xff]  ;;  %v810_v32 = vld [vmem:[#allocation7 + $0x8] sm:$0xff]  ;;  %v809_v34 = vld [vmem:[#allocation7] sm:$0xff]  ;;  %p2282_p6 = scmp.lt.s32.totalorder %s2830_s19, %s2280_s9  ;;  %p2283_p10 = scmp.lt.s32.totalorder %s2281_s26, %s2275_s24 }
  0xa8   : > { %1850 = vmatpush3.msra.mxu0 %v820_v12  ;;  %1884 = vmatprep.subr.mxu1 %v918_v13  ;;  %v908_v33 = vld [vmem:[#allocation8 + $0x8] sm:$0xff]  ;;  %v907_v35 = vld [vmem:[#allocation8] sm:$0xff]  ;;  %v1020_v36 = vld [vmem:[#allocation10 + $0x78] sm:$0xff]  ;;  %p2277_p12 = pnand %p2276_p11, %p2996_p5 }
  0xa9   : > { %768 = vadd.xlane.f32.xlu0 %v2736_v1  ;;  %1851 = vmatprep.subr.mxu0 %v819_v14  ;;  %v1736_v53 = vld [vmem:[%s2935_s11] ss:$0 sm:$0xff]  ;;  %v1019_v63 = vld [vmem:[#allocation10 + $0x70] sm:$0xff]  ;;  %v1018_v2 = vld [vmem:[#allocation10 + $0x68] sm:$0xff]  ;;  %p2284_p3 = por %p2283_p10, %p2282_p6 }
  0xaa   : > { %1885 = vmatpush3.msra.mxu1 %v918_v13  ;;  %1852 = vmatpush3.msra.mxu0 %v819_v14  ;;  %v1737_v55 = vld [vmem:[%s2936_s12] ss:$0 sm:$0xff]  ;;  %v1015_v5 = vld [vmem:[#allocation10 + $0x50] sm:$0xff]  ;;  %v1014_v6 = vld [vmem:[#allocation10 + $0x48] sm:$0xff]  ;;  %p2278_p4 = pneg %p2277_p12 }
  0xab   : > { %777 = vadd.xlane.f32.xlu1 %v774_v4  ;;  %1886 = vmatprep.subr.mxu1 %v917_v15  ;;  %v1017_v3 = vld [vmem:[#allocation10 + $0x60] sm:$0xff]  ;;  %v1016_v4 = vld [vmem:[#allocation10 + $0x58] sm:$0xff]  ;;  %v1011_v9 = vld [vmem:[#allocation10 + $0x30] sm:$0xff] }
  0xac   : > { %1853 = vmatprep.subr.mxu0 %v818_v16  ;;  %1887 = vmatpush3.msra.mxu1 %v917_v15  ;;  %v1013_v7 = vld [vmem:[#allocation10 + $0x40] sm:$0xff]  ;;  %v1012_v8 = vld [vmem:[#allocation10 + $0x38] sm:$0xff]  ;;  %v1010_v10 = vld [vmem:[#allocation10 + $0x28] sm:$0xff]  ;;  %p2285_p8 = pnand %p2284_p3, %p2278_p4 }
  0xad   : > { %1854 = vmatpush3.msra.mxu0 %v818_v16  ;;  %1888 = vmatprep.subr.mxu1 %v916_v17  ;;  %v1009_v11 = vld [vmem:[#allocation10 + $0x20] sm:$0xff]  ;;  %v1008_v12 = vld [vmem:[#allocation10 + $0x18] sm:$0xff]  ;;  %v1007_v13 = vld [vmem:[#allocation10 + $0x10] sm:$0xff] }
  0xae   : > { %1855 = vmatprep.subr.mxu0 %v817_v18  ;;  %1889 = vmatpush3.msra.mxu1 %v916_v17  ;;  %v1006_v14 = vld [vmem:[#allocation10 + $0x8] sm:$0xff]  ;;  %v1005_v15 = vld [vmem:[#allocation10] sm:$0xff] }
  0xaf   : > { %1856 = vmatpush3.msra.mxu0 %v817_v18  ;;  %1890 = vmatprep.subr.mxu1 %v915_v19  ;;  %v1243_v16 = vld [vmem:[%s652_s20] sm:$0xff] }
  0xb0   : > { %1857 = vmatprep.subr.mxu0 %v816_v20  ;;  %1891 = vmatpush3.msra.mxu1 %v915_v19  ;;  %v1739_v17 = vld [vmem:[%s2932_s8] ss:$0 sm:$0xff] }
  0xb1   : > { %1858 = vmatpush3.msra.mxu0 %v816_v20  ;;  %1892 = vmatprep.subr.mxu1 %v914_v21 }
  0xb2   : > { %1859 = vmatprep.subr.mxu0 %v815_v22  ;;  %1893 = vmatpush3.msra.mxu1 %v914_v21  ;;  %v1738_v21 = vld [vmem:[%s2930_s6] ss:$0 sm:$0xff] }
  0xb3   : > { %1860 = vmatpush3.msra.mxu0 %v815_v22  ;;  %1894 = vmatprep.subr.mxu1 %v913_v23 }
  0xb4   : > { %1861 = vmatprep.subr.mxu0 %v814_v24  ;;  %1895 = vmatpush3.msra.mxu1 %v913_v23 }
  0xb5   : > { %1862 = vmatpush3.msra.mxu0 %v814_v24  ;;  %1896 = vmatprep.subr.mxu1 %v912_v25 }
  0xb6   : > { %1863 = vmatprep.subr.mxu0 %v813_v26  ;;  %1897 = vmatpush3.msra.mxu1 %v912_v25 }
  0xb7   : > { %1864 = vmatpush3.msra.mxu0 %v813_v26  ;;  %1898 = vmatprep.subr.mxu1 %v911_v27 }
  0xb8   : > { %1865 = vmatprep.subr.mxu0 %v812_v28  ;;  %1899 = vmatpush3.msra.mxu1 %v911_v27  ;;  %v1740_v27 = vld [vmem:[%s2934_s10] ss:$0 sm:$0xff] }
  0xb9   : > { %1866 = vmatpush3.msra.mxu0 %v812_v28  ;;  %1900 = vmatprep.subr.mxu1 %v910_v29 }
  0xba   : > { %1867 = vmatprep.subr.mxu0 %v811_v30  ;;  %1901 = vmatpush3.msra.mxu1 %v910_v29 }
  0xbb   : > { %1868 = vmatpush3.msra.mxu0 %v811_v30  ;;  %1902 = vmatprep.subr.mxu1 %v909_v31 }
  0xbc   : > { %1869 = vmatprep.subr.mxu0 %v810_v32  ;;  %1903 = vmatpush3.msra.mxu1 %v909_v31 }
  0xbd   : > { %1870 = vmatpush3.msra.mxu0 %v810_v32  ;;  %1904 = vmatprep.subr.mxu1 %v908_v33  ;;  %v1244_v32 = vld [vmem:[%s652_s20 + $0x8] sm:$0xff]  ;;  %s1477_s20 = scalar_lea.sflag [#allocation4], %s2695_s3 }
  0xbe   : > { %1871 = vmatprep.subr.mxu0 %v809_v34  ;;  %1905 = vmatpush3.msra.mxu1 %v908_v33 }
  0xbf   : > { %1872 = vmatpush3.msra.mxu0 %v809_v34  ;;  %1906 = vmatprep.subr.mxu1 %v907_v35 }
  0xc0   : > { %1907 = vmatpush3.msra.mxu1 %v907_v35  ;;  %1911 = vmatprep.subr.mxu0 %v1020_v36 }
 0x12e   : > { %v767_v37 = vpop.xlane.xlu0 %766 }
 0x12f   : > { %v771_v38 = vmul.f32 0.0078125, %v767_v37 }
 0x130   : > { %v776_v39 = vpop.xlane.xlu1 %775 }
 0x131   : > { %v781_v40 = vmul.f32 %v771_v38, %v771_v38  ;;  %v779_v41 = vmul.f32 0.0078125, %v776_v39  ;;  %v785_v51 = vsub.f32 %v2734_v0, %v771_v38  ;;  %v763_v38 = vld [vmem:[%s643_s7 + $0x8] sm:$0xff]  ;;  %v762_v39 = vld [vmem:[%s643_s7] sm:$0xff] }
 0x132   : > { %v769_v42 = vpop.xlane.xlu0 %768 }
 0x133   : > { %v783_v43 = vsub.f32 %v779_v41, %v781_v40  ;;  %v772_v44 = vmul.f32 0.0078125, %v769_v42 }
 0x134   : > { %v778_v45 = vpop.xlane.xlu1 %777 }
 0x135   : > { %v787_v46 = vadd.f32 1e-06, %v783_v43  ;;  %v782_v47 = vmul.f32 %v772_v44, %v772_v44  ;;  %v780_v48 = vmul.f32 0.0078125, %v778_v45  ;;  %v786_v56 = vsub.f32 %v2736_v1, %v772_v44  ;;  %v1387_v44 = vld [vmem:[#allocation11 + $0x78] sm:$0xff]  ;;  %v1386_v45 = vld [vmem:[#allocation11 + $0x70] sm:$0xff] }
 0x137   : > { %2099 = vrsqrt.f32 %v787_v46  ;;  %v784_v49 = vsub.f32 %v780_v48, %v782_v47  ;;  %v1385_v46 = vld [vmem:[#allocation11 + $0x68] sm:$0xff]  ;;  %v1384_v47 = vld [vmem:[#allocation11 + $0x60] sm:$0xff]  ;;  %v1383_v48 = vld [vmem:[#allocation11 + $0x58] sm:$0xff] }
 0x139   : > { %v788_v50 = vadd.f32 1e-06, %v784_v49  ;;  %v1382_v49 = vld [vmem:[#allocation11 + $0x50] sm:$0xff] }
 0x13b   : > { %2101 = vrsqrt.f32 %v788_v50  ;;  %v1381_v50 = vld [vmem:[#allocation11 + $0x48] sm:$0xff] }
 0x144   : > { %v2100_v52 = vpop.eup %2099 }
 0x145   : > { %v791_v54 = vmul.f32 %v2100_v52, %v785_v51  ;;  %v1380_v51 = vld [vmem:[#allocation11 + $0x40] sm:$0xff]  ;;  %v1379_v52 = vld [vmem:[#allocation11 + $0x38] sm:$0xff] }
 0x147   : > { %v799_v57 = vmul.f32 %v1736_v53, %v791_v54  ;;  %v1377_v54 = vld [vmem:[#allocation11 + $0x28] sm:$0xff] }
 0x148   : > { %v2102_v58 = vpop.eup %2101 }
 0x149   : > { %v807_v59 = vadd.f32 %v1737_v55, %v799_v57  ;;  %v792_v60 = vmul.f32 %v2102_v58, %v786_v56  ;;  %v1375_v56 = vld [vmem:[#allocation11 + $0x18] sm:$0xff]  ;;  %v1374_v57 = vld [vmem:[#allocation11 + $0x10] sm:$0xff]  ;;  %v1373_v58 = vld [vmem:[#allocation11 + $0x8] sm:$0xff] }
 0x14b   : > { %1873 = vmatprep.mubr.f32.mxu0 %v807_v59  ;;  %1908 = vmatprep.mubr.f32.mxu1 %v807_v59  ;;  %v800_v61 = vmul.f32 %v1736_v53, %v792_v60  ;;  %v1378_v53 = vld [vmem:[#allocation11 + $0x30] sm:$0xff] }
 0x14d   : > { %v808_v62 = vadd.f32 %v1737_v55, %v800_v61  ;;  %v1376_v55 = vld [vmem:[#allocation11 + $0x20] sm:$0xff] }
 0x14f   : > { %1874 = vmatmul.mubr.f32.vlgmr.msra.gmra.mxu0 %v808_v62  ;;  %1909 = vmatmul.mubr.f32.vlgmr.msra.gmra.mxu1 %v808_v62 }
 0x150   : > { %1912 = vmatpush3.msra.mxu0 %v1020_v36  ;;  %1943 = vmatprep.mubr.f32.mxu0 %v807_v59  ;;  %v1741_v36 = vld [vmem:[%s756_s5] ss:$0 sm:$0xff]  ;;  %s2995_s5 = sld [smem:[#allocation36_spill]] }
 0x151   : > { %1913 = vmatprep.subr.mxu0 %v1019_v63  ;;  %1957 = vmatprep.mubr.msk.f32.mxu1 %vm1190_vm0, %v1243_v16  ;;  %v2785_v41 = vmul.f32 %v1741_v36, %v763_v38  ;;  %v2789_v42 = vmul.f32 %v1741_v36, %v762_v39  ;;  %v1372_v59 = vld [vmem:[#allocation11] sm:$0xff]  ;;  %v2395_v38 = vmov 0  }
 0x152   : > { %1914 = vmatpush3.msra.mxu0 %v1019_v63  ;;  %2098 = vset.pattern.permute.xlu1 %v2395_v38 }
 0x153   : > { %1915 = vmatprep.subr.mxu0 %v1018_v2  ;;  %v1191_v43 = vsel %vm1190_vm0, %v2789_v42, 0.0  ;;  %vm1189_vm1 = vcmp.gt.f32.partialorder %v2785_v41, 0.0  ;;  %vm1188_vm2 = vcmp.gt.f32.partialorder %v2789_v42, 0.0  ;;  %2097 = vset.pattern.permute.xlu0 %v2395_v38 }
 0x154   : > { %1916 = vmatpush3.msra.mxu0 %v1018_v2 }
 0x155   : > { %1917 = vmatprep.subr.mxu0 %v1017_v3 }
 0x156   : > { %1918 = vmatpush3.msra.mxu0 %v1017_v3  ;;  %s2837_s7 = scalar_lea.hbm %s2995_s5, %s1759_s1 }
 0x157   : > { %1919 = vmatprep.subr.mxu0 %v1016_v4 }
 0x158   : > { %1920 = vmatpush3.msra.mxu0 %v1016_v4 }
 0x159   : > { %1921 = vmatprep.subr.mxu0 %v1015_v5 }
 0x15a   : > { %1922 = vmatpush3.msra.mxu0 %v1015_v5 }
 0x15b   : > { %1923 = vmatprep.subr.mxu0 %v1014_v6 }
 0x15c   : > { %1924 = vmatpush3.msra.mxu0 %v1014_v6 }
 0x15d   : > { %1925 = vmatprep.subr.mxu0 %v1013_v7 }
 0x15e   : > { %1926 = vmatpush3.msra.mxu0 %v1013_v7 }
 0x15f   : > { %1927 = vmatprep.subr.mxu0 %v1012_v8 }
 0x160   : > { %1928 = vmatpush3.msra.mxu0 %v1012_v8 }
 0x161   : > { %1929 = vmatprep.subr.mxu0 %v1011_v9 }
 0x162   : > { %1930 = vmatpush3.msra.mxu0 %v1011_v9 }
 0x163   : > { %1931 = vmatprep.subr.mxu0 %v1010_v10 }
 0x164   : > { %1932 = vmatpush3.msra.mxu0 %v1010_v10 }
 0x165   : > { %1933 = vmatprep.subr.mxu0 %v1009_v11 }
 0x166   : > { %1934 = vmatpush3.msra.mxu0 %v1009_v11 }
 0x167   : > { %1935 = vmatprep.subr.mxu0 %v1008_v12 }
 0x168   : > { %1936 = vmatpush3.msra.mxu0 %v1008_v12 }
 0x169   : > { %1937 = vmatprep.subr.mxu0 %v1007_v13 }
 0x16a   : > { %1938 = vmatpush3.msra.mxu0 %v1007_v13 }
 0x16b   : > { %1939 = vmatprep.subr.mxu0 %v1006_v14 }
 0x16c   : > { %1940 = vmatpush3.msra.mxu0 %v1006_v14 }
 0x16d   : > { %1941 = vmatprep.subr.mxu0 %v1005_v15 }
 0x16e   : > { %1942 = vmatpush3.msra.mxu0 %v1005_v15 }
 0x16f   : > { %1944 = vmatmul.mubr.f32.vlgmr.msra.gmra.mxu0 %v808_v62 }
 0x20f   : > { %v1875_v18 = vpop.f32.mrf.mxu0  ;;  %v1910_v19 = vpop.f32.mrf.mxu1 }
 0x210   : > { %v1002_v20 = vadd.f32 %v1910_v19, %v1739_v17  ;;  %v904_v26 = vadd.f32 %v1875_v18, %v1738_v21 }
 0x211   : > { %v898_v22 = vpop.f32.mrf.mxu0  ;;  %v996_v23 = vpop.f32.mrf.mxu1 }
 0x212   : > { %v899_v24 = vadd.f32 %v1738_v21, %v898_v22  ;;  %v997_v25 = vadd.f32 %v1739_v17, %v996_v23  ;;  %1946 = vmatprep.subr.mxu0 %v1002_v20 }
 0x213   : > { %1947 = vmatpush3.xpose.msra.mxu0 %v1002_v20 }
 0x214   : > { %1948 = vmatprep.subr.mxu0 %v997_v25  ;;  %1950 = vmatprep.mubr.f32.mxu0 %v899_v24 }
 0x217   : > { %1949 = vmatpush3.xpose.msra.mxu0 %v997_v25 }
 0x21a   : > { %1951 = vmatmul.mubr.f32.vlgmr.msra.gmra.mxu0 %v904_v26 }
 0x22f   : > { %v1945_v28 = vpop.f32.mrf.mxu0 }
 0x230   : > { %v1100_v29 = vadd.f32 %v1945_v28, %v1740_v27 }
 0x231   : > { %v1094_v30 = vpop.f32.mrf.mxu0 }
 0x232   : > { %v1095_v31 = vadd.f32 %v1740_v27, %v1094_v30  ;;  %1953 = vmatprep.subr.mxu1 %v1100_v29  ;;  %v1744_v27 = vld [vmem:[%s2937_s13] ss:$0 sm:$0xff] }
 0x233   : > { %1954 = vmatpush3.msra.mxu1 %v1100_v29 }
 0x234   : > { %1955 = vmatprep.subr.mxu1 %v1095_v31 }
 0x235   : > { %1956 = vmatpush3.msra.mxu1 %v1095_v31 }
 0x236   : > { %1958 = vmatmul.mubr.msk.f32.vlgmr.msra.gmra.mxu1 %vm1190_vm0, %v1244_v32  ;;  %1960 = vmatprep.subr.mxu1 %v1387_v44  ;;  %v1745_v32 = vld [vmem:[%s2938_s14] ss:$0 sm:$0xff] }
 0x237   : > { %1961 = vmatpush3.msra.mxu1 %v1387_v44 }
 0x238   : > { %1962 = vmatprep.subr.mxu1 %v1386_v45 }
 0x239   : > { %1963 = vmatpush3.msra.mxu1 %v1386_v45 }
 0x23a   : > { %1964 = vmatprep.subr.mxu1 %v1385_v46 }
 0x23b   : > { %1965 = vmatpush3.msra.mxu1 %v1385_v46 }
 0x23c   : > { %1966 = vmatprep.subr.mxu1 %v1384_v47 }
 0x23d   : > { %1967 = vmatpush3.msra.mxu1 %v1384_v47  ;;  %v760_v47 = vld [vmem:[%s753_s21 + $0x8] sm:$0xff] }
 0x23e   : > { %1968 = vmatprep.subr.mxu1 %v1383_v48 }
 0x23f   : > { %1969 = vmatpush3.msra.mxu1 %v1383_v48  ;;  %v759_v48 = vld [vmem:[%s753_s21] sm:$0xff] }
 0x240   : > { %1970 = vmatprep.subr.mxu1 %v1382_v49 }
 0x241   : > { %1971 = vmatpush3.msra.mxu1 %v1382_v49  ;;  %v1746_v49 = vld [vmem:[%s2940_s16] ss:$0 sm:$0xff] }
 0x242   : > { %1972 = vmatprep.subr.mxu1 %v1381_v50 }
 0x243   : > { %1973 = vmatpush3.msra.mxu1 %v1381_v50 }
 0x244   : > { %1974 = vmatprep.subr.mxu1 %v1380_v51 }
 0x245   : > { %1975 = vmatpush3.msra.mxu1 %v1380_v51 }
 0x246   : > { %1976 = vmatprep.subr.mxu1 %v1379_v52 }
 0x247   : > { %1977 = vmatpush3.msra.mxu1 %v1379_v52 }
 0x248   : > { %1978 = vmatprep.subr.mxu1 %v1378_v53 }
 0x249   : > { %1979 = vmatpush3.msra.mxu1 %v1378_v53 }
 0x24a   : > { %1980 = vmatprep.subr.mxu1 %v1377_v54 }
 0x24b   : > { %1981 = vmatpush3.msra.mxu1 %v1377_v54 }
 0x24c   : > { %1982 = vmatprep.subr.mxu1 %v1376_v55 }
 0x24d   : > { %1983 = vmatpush3.msra.mxu1 %v1376_v55 }
 0x24e   : > { %1984 = vmatprep.subr.mxu1 %v1375_v56 }
 0x24f   : > { %1985 = vmatpush3.msra.mxu1 %v1375_v56 }
 0x250   : > { %1986 = vmatprep.subr.mxu1 %v1374_v57 }
 0x251   : > { %1987 = vmatpush3.msra.mxu1 %v1374_v57 }
 0x252   : > { %1988 = vmatprep.subr.mxu1 %v1373_v58 }
 0x253   : > { %1989 = vmatpush3.msra.mxu1 %v1373_v58 }
 0x254   : > { %1990 = vmatprep.subr.mxu1 %v1372_v59 }
 0x255   : > { %1991 = vmatpush3.msra.mxu1 %v1372_v59 }
 0x2da   : > { %v1952_v60 = vpop.f32.mrf.mxu0 }
 0x2db   : > { %v1179_v5 = vmul.f32 0.088388346, %v1952_v60 }
 0x2dc   : > { %v1169_v2 = vpop.f32.mrf.mxu0 }
 0x2dd   : > { %v1178_v8 = vmul.f32 0.088388346, %v1169_v2  ;;  %v1200_v16 = vsel %vm1189_vm1, %v1179_v5, -1e+30 }
 0x2df   : > { %v1199_v17 = vsel %vm1188_vm2, %v1178_v8, -1e+30 }
 0x2f6   : > { %v1959_v33 = vpop.f32.mrf.mxu1 }
 0x2f7   : > { %v2772_v34 = vadd.f32 %v1959_v33, %v2736_v1 }
 0x2f8   : > { %v1317_v35 = vpop.f32.mrf.mxu1 }
 0x2f9   : > { %v2775_v37 = vadd.f32 %v1317_v35, %v2734_v0  ;;  %1332 = vadd.xlane.f32.xlu1 %v2772_v34  ;;  %v1337_v40 = vmul.f32 %v2772_v34, %v2772_v34  ;;  %v1194_v0 = vsel %vm1190_vm0, %v2785_v41, 0.0 }
 0x2fb   : > { %1330 = vadd.xlane.f32.xlu0 %v2775_v37  ;;  %v1336_v1 = vmul.f32 %v2775_v37, %v2775_v37 }
 0x2fd   : > { %1340 = vadd.xlane.f32.xlu1 %v1337_v40 }
 0x2ff   : > { %1338 = vadd.xlane.f32.xlu0 %v1336_v1 }
 0x301   : > { %1195 = vadd.xlane.f32.xlu1 %v1194_v0 }
 0x303   : > { %1192 = vadd.xlane.f32.xlu0 %v1191_v43 }
 0x382   : > { %v1333_v61 = vpop.xlane.xlu1 %1332 }
 0x383   : > { %v1335_v62 = vmul.f32 0.0078125, %v1333_v61 }
 0x384   : > { %v1331_v63 = vpop.xlane.xlu0 %1330 }
 0x385   : > { %v1334_v3 = vmul.f32 0.0078125, %v1331_v63  ;;  %v1345_v6 = vmul.f32 %v1335_v62, %v1335_v62  ;;  %v1349_v24 = vsub.f32 %v2772_v34, %v1335_v62 }
 0x386   : > { %v1341_v4 = vpop.xlane.xlu1 %1340 }
 0x387   : > { %v1343_v7 = vmul.f32 0.0078125, %v1341_v4  ;;  %v1344_v10 = vmul.f32 %v1334_v3, %v1334_v3  ;;  %v1348_v26 = vsub.f32 %v2775_v37, %v1334_v3 }
 0x388   : > { %v1339_v9 = vpop.xlane.xlu0 %1338 }
 0x389   : > { %v1347_v11 = vsub.f32 %v1343_v7, %v1345_v6  ;;  %v1342_v12 = vmul.f32 0.0078125, %v1339_v9 }
 0x38a   : > { %v2797_v13 = vpop.xlane.xlu1 %1195 }
 0x38b   : > { %v1351_v14 = vadd.f32 1e-06, %v1347_v11  ;;  %v1346_v15 = vsub.f32 %v1342_v12, %v1344_v10  ;;  %vm1198_vm3 = vcmp.gt.f32.partialorder %v2797_v13, 0.0 }
 0x38c   : > { %v2800_v18 = vpop.xlane.xlu0 %1192  ;;  %v1206_v19 = vsel %vm1198_vm3, %v1200_v16, 0.0 }
 0x38d   : > { %2103 = vrsqrt.f32 %v1351_v14  ;;  %v1350_v20 = vadd.f32 1e-06, %v1346_v15  ;;  %vm1197_vm4 = vcmp.gt.f32.partialorder %v2800_v18, 0.0  ;;  %v1210_v21 = vsel %vm1190_vm0, %v1206_v19, -inf }
 0x38e   : > { %1211 = vmax.xlane.f32.xlu1 %v1210_v21  ;;  %v1205_v22 = vsel %vm1197_vm4, %v1199_v17, 0.0 }
 0x38f   : > { %2105 = vrsqrt.f32 %v1350_v20  ;;  %v1207_v23 = vsel %vm1190_vm0, %v1205_v22, -inf }
 0x390   : > { %1208 = vmax.xlane.f32.xlu0 %v1207_v23 }
 0x39a   : > { %v2104_v25 = vpop.eup %2103 }
 0x39b   : > { %v1355_v28 = vmul.f32 %v2104_v25, %v1349_v24 }
 0x39c   : > { %v2106_v29 = vpop.eup %2105 }
 0x39d   : > { %v1354_v30 = vmul.f32 %v2106_v29, %v1348_v26  ;;  %v1363_v31 = vmul.f32 %v1744_v27, %v1355_v28 }
 0x39f   : > { %v1362_v33 = vmul.f32 %v1744_v27, %v1354_v30  ;;  %v1371_v36 = vadd.f32 %v1745_v32, %v1363_v31 }
 0x3a1   : > { %v1370_v35 = vadd.f32 %v1745_v32, %v1362_v33 }
 0x3a3   : > { %1992 = vmatprep.mubr.f32.mxu1 %v1370_v35 }
 0x3a4   : > { %1993 = vmatmul.mubr.f32.vlgmr.msra.gmra.mxu1 %v1371_v36 }
 0x417   : > { %v1212_v39 = vpop.xlane.xlu1 %1211 }
 0x418   : > { %v1214_v40 = vsub.f32 %v1206_v19, %v1212_v39 }
 0x419   : > { %v1209_v41 = vpop.xlane.xlu0 %1208 }
 0x41a   : > { %v1217_v1 = vmul.f32 1.442695, %v1214_v40  ;;  %v1213_v42 = vsub.f32 %v1205_v22, %v1209_v41 }
 0x41c   : > { %2107 = vpow2.f32 %v1217_v1  ;;  %v1215_v0 = vmul.f32 1.442695, %v1213_v42 }
 0x41e   : > { %2109 = vpow2.f32 %v1215_v0 }
 0x429   : > { %v2108_v43 = vpop.eup %2107 }
 0x42a   : > { %v1222_v44 = vsel %vm1190_vm0, %v2108_v43, 0.0 }
 0x42b   : > { %v2110_v45 = vpop.eup %2109  ;;  %1223 = vadd.xlane.f32.xlu1 %v1222_v44 }
 0x42c   : > { %v1219_v46 = vsel %vm1190_vm0, %v2110_v45, 0.0 }
 0x42d   : > { %1220 = vadd.xlane.f32.xlu0 %v1219_v46 }
 0x43c   : > { %1238 = vperm.xlu1 %2098, %v760_v47  }
 0x443   : > { %1233 = vperm.xlu0 %2097, %v759_v48  }
 0x464   : > { %v1994_v50 = vpop.f32.mrf.mxu1 }
 0x465   : > { %v1467_v51 = vadd.f32 %v1994_v50, %v1746_v49 }
 0x466   : > { %v1461_v52 = vpop.f32.mrf.mxu1 }
 0x467   : > { %v1471_v53 = vadd.f32 %v1467_v51, %v2772_v34  ;;  %v1462_v54 = vadd.f32 %v1746_v49, %v1461_v52 }
 0x469   : > { %1473 = vst [vmem:[%s736_s27 + $0x8] sm:$0xff] %v1471_v53  ;;  %v1470_v55 = vadd.f32 %v1462_v54, %v2775_v37 }
 0x46b   : > { %1472 = vst [vmem:[%s736_s27] sm:$0xff] %v1470_v55 }
 0x46c   : > { %2288 = shalt.err (!%p2285_p8)
}
 0x46d   : > { %s2289_s15 = scalar_lea.hbm %s2837_s7, 256  ;;  %s2293_s23 = scalar_lea.hbm %s2995_s5, 512 }
 0x46e   : > { %p2290_p2 = scmp.ne.s32.totalorder %s2837_s7, %s2289_s15  ;;  %p2294_p1 = scmp.lt.s32.totalorder %s2837_s7, %s2995_s5 }
 0x46f   : > { %p2295_p13 = scmp.lt.s32.totalorder %s2293_s23, %s2289_s15 }
 0x470   : > { %p2291_p9 = pnand %p2290_p2, %p2996_p5 }
 0x471   : > { %p2296_p0 = por %p2295_p13, %p2294_p1 }
 0x472   : > { %p2292_p7 = pneg %p2291_p9 }
 0x474   : > { %p2297_p11 = pnand %p2296_p0, %p2292_p7 }
 0x476   : > { %2300 = shalt.err (!%p2297_p11)
}
 0x477   : > { %s2397_s22 = smov 128   ;;  %s2398_s24 = smov 8  }
 0x478   : > { %2015 = dma.vmem_to_hbm [thread:$0]  (%p2996_p5), %s2830_s19, 256, %s2837_s7, %s1477_s20, %s2397_s22, %s2397_s22, %s2398_s24  }
 0x479   : > { %s743_s2 = scalar_lea.vmem [#allocation14], %s2698_s25  ;;  %s2997_s7 = sld [smem:[#allocation37_spill]] }
 0x47a   : > { %s1511_s9 = sshll.u32 %s743_s2, 4  ;;  %s1482_s26 = scalar_lea.sflag [#allocation15], %s2695_s3  ;;  %s2869_s9 = int_to_ptr.vmem [resolvable:$true] %s1511_s9 }
 0x47b   : > { %s2301_s15 = scalar_lea.vmem %s2869_s9, 256  ;;  %s2399_s21 = smov [#allocation14]  }
 0x47c   : > { %p2302_p12 = scmp.ne.s32.totalorder %s2869_s9, %s2301_s15  ;;  %s2305_s17 = sshll.u32 %s2399_s21, 4  ;;  %s2306_s17 = int_to_ptr.vmem [resolvable:$false] %s2305_s17 }
 0x47d   : > { %s2307_s23 = scalar_lea.vmem %s2306_s17, 512  ;;  %p2308_p10 = scmp.lt.s32.totalorder %s2869_s9, %s2306_s17 }
 0x47e   : > { %p2303_p4 = pnand %p2302_p12, %p2996_p5  ;;  %p2309_p3 = scmp.lt.s32.totalorder %s2307_s23, %s2301_s15 }
 0x47f   : > { %s2879_s20 = scalar_lea.hbm %s2997_s7, %s1759_s1 }
 0x480   : > { %p2304_p6 = pneg %p2303_p4  ;;  %p2310_p8 = por %p2309_p3, %p2308_p10 }
 0x482   : > { %p2311_p2 = pnand %p2310_p8, %p2304_p6 }
 0x4b4   : > { %v1224_v34 = vpop.xlane.xlu1 %1223 }
 0x4b5   : > { %2111 = vrcp.f32 %v1224_v34 }
 0x4b6   : > { %v1221_v37 = vpop.xlane.xlu0 %1220 }
 0x4b7   : > { %2113 = vrcp.f32 %v1221_v37 }
 0x4b8   : > { %v1239_v58 = vpop.permute.xlu1 %1238 }
 0x4be   : > { %v1234_v62 = vpop.permute.xlu0 %1233 }
 0x4c2   : > { %v2112_v56 = vpop.eup %2111 }
 0x4c3   : > { %v1228_v57 = vmul.f32 %v2112_v56, %v2108_v43 }
 0x4c4   : > { %v2114_v59 = vpop.eup %2113 }
 0x4c5   : > { %v1230_v60 = vsel %vm1198_vm3, %v1228_v57, 0.0  ;;  %v1226_v61 = vmul.f32 %v2114_v59, %v2110_v45 }
 0x4c6   : > { %v1242_v63 = vmul.f32 %v1239_v58, %v1230_v60 }
 0x4c7   : > { %v1229_v2 = vsel %vm1197_vm4, %v1226_v61, 0.0 }
 0x4c8   : > { %1475 = vst.msk [vmem:[%s743_s2 + $0x8] sm:$0xff] %vm1190_vm0, %v1242_v63  ;;  %v1241_v3 = vmul.f32 %v1234_v62, %v1229_v2 }
 0x4ca   : > { %1474 = vst.msk [vmem:[%s743_s2] sm:$0xff] %vm1190_vm0, %v1241_v3 }
 0x4cb   : > { %2314 = shalt.err (!%p2311_p2)
}
 0x4cc   : > { %s2315_s0 = scalar_lea.hbm %s2879_s20, 256  ;;  %s2319_s27 = scalar_lea.hbm %s2997_s7, 512 }
 0x4cd   : > { %p2316_p9 = scmp.ne.s32.totalorder %s2879_s20, %s2315_s0  ;;  %p2320_p13 = scmp.lt.s32.totalorder %s2879_s20, %s2997_s7 }
 0x4ce   : > { %p2321_p0 = scmp.lt.s32.totalorder %s2319_s27, %s2315_s0 }
 0x4cf   : > { %p2317_p7 = pnand %p2316_p9, %p2996_p5 }
 0x4d0   : > { %p2322_p11 = por %p2321_p0, %p2320_p13 }
 0x4d1   : > { %p2318_p1 = pneg %p2317_p7 }
 0x4d3   : > { %p2323_p12 = pnand %p2322_p11, %p2318_p1 }
 0x4d5   : > { %2326 = shalt.err (!%p2323_p12)
}
 0x4d6   : > { %2016 = dma.vmem_to_hbm [thread:$0]  (%p2996_p5), %s2869_s9, 256, %s2879_s20, %s1482_s26, %s2397_s22, %s2397_s22, %s2398_s24  }
 0x4d7 PF: > { %s2998_s25 = sld [smem:[#allocation23_spill]]  ;;  %p3001_p6 = scmp.ge.s32.totalorder %s2385_s30, 2 }
 0x4d8   : > { %s2999_s19 = sld [smem:[#allocation25_spill]] }
 0x4dd   : > { %s1526_s15 = sand.u32 1, %s2998_s25  }
 0x4de   : > { %p3000_p4 = scmp.ne.s32.totalorder %s2999_s19, 0  ;;  %s1527_s21 = scalar_lea.sflag [#allocation4], %s1526_s15 }
 0x4e0   : > { %p2040_p10 = pnand %p3001_p6, %p3000_p4 }
 0x4e2   : > { %p2041_p3 = pneg %p2040_p10 }
 0x4e4   : > { %2364 = dma.done.wait (%p2041_p3), %s1527_s21, 256  }
 0x4e5   : > { %2366 = vsyncadd (%p2041_p3), %s1527_s21, 4294967040  ;;  %s1536_s17 = scalar_lea.sflag [#allocation15], %s1526_s15 }
 0x4e6   : > { %2368 = dma.done.wait (%p2041_p3), %s1536_s17, 256  }
 0x4e7   : > { %2370 = vsyncadd (%p2041_p3), %s1536_s17, 4294967040  ;;  %s3002_s30 = sld [smem:[#allocation26_spill]]  ;;  %s3005_s27 = smov %s2377_s28 }
 0x4e8   : > { %s3003_s18 = sld [smem:[#allocation24_spill]] }
 0x4e9   : > { %s3004_s29 = sld [smem:[#allocation27_spill]] }
 0x4ed   : > { %p40_p5 = scmp.ge.s32.totalorder %s3002_s30, 4  }
 0x4ee   : > { %s3006_s28 = smov %s3003_s18 }
 0x4ef   :  { %42 = sbr.rel (!%p40_p5) target bundleno = 22 (0x16), region = 188 }
 0x4f4   :  { %1541 = vsyncpa [#allocation3], 1 }
 0x4f5   :  { %1543 = vsyncpa [#allocation3 + $0x1], 1 }
 0x4f6   :  { %1544 = vsyncpa [#allocation6], 1 }
 0x4f7   :  { %1546 = vsyncpa [#allocation6 + $0x1], 1 }
 0x4f8   :  { %1547 = vsyncpa [#allocation9], 1 }
 0x4f9   :  { %1548 = vsyncpa [#allocation12], 1 }
 0x4fa   :  { %1549 = vsyncpa [#allocation4], 1 }
 0x4fb   :  { %1551 = vsyncpa [#allocation4 + $0x1], 1 }
 0x4fc   :  { %1552 = vsyncpa [#allocation15], 1 }
 0x4fd   :  { %1554 = vsyncpa [#allocation15 + $0x1], 1 }

</bundles_post_ra>
